<compile_context>
chip_gen: v7x
topology: tpu7x:2x2x1
jax: 0.10.0
libtpu: 0.0.40
codegen_flags: <defaults>
</compile_context>

<pallas_src>
import functools

import jax
import jax.numpy as jnp
from jax import lax
from jax.experimental import pallas as pl
from jax.experimental.pallas import tpu as pltpu


def attention_layer_kernel(q_ref, k_ref, v_ref,
                           wq_ref, bq_ref, wk_ref, bk_ref, wv_ref, bv_ref,
                           wo_ref, bo_ref, gamma_ref, beta_ref,
                           o_ref, *, num_heads, head_dim):
    Bt, Sq, D = q_ref.shape
    _, Sk, _ = k_ref.shape
    H, dk = num_heads, head_dim
    HD = H * dk
    rows_q = Bt * Sq
    rows_k = Bt * Sk
    scale = 1.0 / (float(dk) ** 0.5)

    # Flatten to lane-dense (rows, D) for the projections; keep f32 residual.
    q_res = q_ref[...].reshape(rows_q, D)
    q2 = q_res.astype(jnp.bfloat16)
    k2 = k_ref[...].reshape(rows_k, D).astype(jnp.bfloat16)
    v2 = v_ref[...].reshape(rows_k, D).astype(jnp.bfloat16)

    # Fused full-width projections: (rows, D) @ (D, H*dk), bias add in f32,
    # then a single bf16 cast per tensor (halves live slab footprint).
    q_proj = ((jnp.dot(q2, wq_ref[...], preferred_element_type=jnp.float32)
               + bq_ref[...]).astype(jnp.bfloat16).reshape(Bt, Sq, HD))
    k_proj = ((jnp.dot(k2, wk_ref[...], preferred_element_type=jnp.float32)
               + bk_ref[...]).astype(jnp.bfloat16).reshape(Bt, Sk, HD))
    v_proj = ((jnp.dot(v2, wv_ref[...], preferred_element_type=jnp.float32)
               + bv_ref[...]).astype(jnp.bfloat16).reshape(Bt, Sk, HD))

    # Per-head scaled dot-product attention (bf16 MXU operands, f32 softmax).
    ctx_heads = []
    for h in range(H):
        lo = h * dk
        qh = q_proj[:, :, lo:lo + dk]
        kh = k_proj[:, :, lo:lo + dk]
        vh = v_proj[:, :, lo:lo + dk]

        # scores: contract last dims of both operands (no explicit transpose).
        s = lax.dot_general(
            qh, kh, dimension_numbers=(((2,), (2,)), ((0,), (0,))),
            preferred_element_type=jnp.float32) * scale     # (Bt, Sq, Sk) f32
        s = s - jnp.max(s, axis=-1, keepdims=True)
        p = jnp.exp(s)
        p = p * pl.reciprocal(jnp.sum(p, axis=-1, keepdims=True), approx=True)

        ctx = lax.dot_general(
            p.astype(jnp.bfloat16), vh,
            dimension_numbers=(((2,), (1,)), ((0,), (0,))),
            preferred_element_type=jnp.float32)              # (Bt, Sq, dk) f32
        ctx_heads.append(ctx.astype(jnp.bfloat16))

    # Fused output projection: one (rows, H*dk) @ (H*dk, D) matmul (K=128).
    ctx_all = jnp.concatenate(ctx_heads, axis=-1).reshape(rows_q, HD)
    mha = jnp.dot(ctx_all, wo_ref[...], preferred_element_type=jnp.float32)

    # Residual (dropout = identity in eval) + LayerNorm (two-pass variance).
    x = q_res + mha + bo_ref[...]
    mean = jnp.mean(x, axis=-1, keepdims=True)
    d = x - mean
    var = jnp.mean(d * d, axis=-1, keepdims=True)
    xn = d * lax.rsqrt(var + 1e-5)
    out = xn * gamma_ref[...] + beta_ref[...]
    o_ref[...] = out.reshape(Bt, Sq, D)


def _pick_blocks(B, S, rows_target=512):
    """Pick (batch_block, seq_block): fill ~rows_target rows per grid step but
    keep >= 2 grid steps when possible so both v7x TensorCores get work."""
    sb = S
    if S > rows_target:
        for d in range(8, S, 8):               # largest mult-of-8 divisor <= target
            if S % d == 0 and d <= rows_target:
                sb = d
    bb = 1
    for d in range(1, B + 1):                  # largest divisor of B that fits
        if B % d == 0 and d * sb <= rows_target:
            bb = d
    if (B // bb) * (S // sb) < 2:              # avoid a 1-step grid
        if B >= 2:
            divs = [d for d in range(1, B) if B % d == 0]
            if divs:
                bb = max(divs)
        elif sb == S and S % 16 == 0:
            sb = S // 2
    return bb, sb


def _vmem_bytes_estimate(bb, sb, S, D, HD):
    f32, bf16 = 4, 2
    q_blk = bb * sb * D * f32
    kv_blk = bb * S * D * f32
    io = 2 * (2 * q_blk + 2 * kv_blk)                       # double-buffered q,out,k,v
    w = 2 * ((3 * D * HD + HD * D) * bf16 + 8 * max(D, HD) * f32)
    proj = (bb * sb * HD + 2 * bb * S * HD) * bf16 + bb * S * HD * f32
    scores = 3 * bb * sb * S * f32                          # s, p, temporaries
    misc = 4 * bb * sb * D * f32                            # mha, x, xn, out
    return io + w + proj + scores + misc


def attention_layer(q, k, v, params, *, batch_block=None, seq_block=None):
    B, S, D = q.shape
    H, Dw, dk = params["wq"].shape
    assert Dw == D
    bb, sb = _pick_blocks(B, S)
    if batch_block is not None:
        bb = batch_block
    if seq_block is not None:
        sb = seq_block
    assert B % bb == 0 and S % sb == 0
    grid = (B // bb, S // sb)

    # Host-side packing: fused full-width projection weights (bf16 for MXU),
    # lane-dense biases / LN params, fused (H*dk, D) output projection.
    wq_p = jnp.transpose(params["wq"], (1, 0, 2)).reshape(D, H * dk).astype(jnp.bfloat16)
    wk_p = jnp.transpose(params["wk"], (1, 0, 2)).reshape(D, H * dk).astype(jnp.bfloat16)
    wv_p = jnp.transpose(params["wv"], (1, 0, 2)).reshape(D, H * dk).astype(jnp.bfloat16)
    bq_p = params["bq"].reshape(1, H * dk)
    bk_p = params["bk"].reshape(1, H * dk)
    bv_p = params["bv"].reshape(1, H * dk)
    wo_p = params["wo"].astype(jnp.bfloat16)                # (H*dk, D)
    bo_p = params["bo"].reshape(1, D)
    gamma_p = params["gamma"].reshape(1, D)
    beta_p = params["beta"].reshape(1, D)

    q_spec = pl.BlockSpec((bb, sb, D), lambda b, s: (b, s, 0))
    kv_spec = pl.BlockSpec((bb, S, D), lambda b, s: (b, 0, 0))
    full2 = lambda r, c: pl.BlockSpec((r, c), lambda b, s: (0, 0))

    vmem_limit = int(min(max(2 * _vmem_bytes_estimate(bb, sb, S, D, H * dk),
                             32 * 1024 * 1024), 64 * 1024 * 1024))

    kernel = functools.partial(attention_layer_kernel, num_heads=H, head_dim=dk)

    return pl.pallas_call(
        kernel,
        out_shape=jax.ShapeDtypeStruct((B, S, D), jnp.float32),
        grid_spec=pltpu.PrefetchScalarGridSpec(
            num_scalar_prefetch=0,
            grid=grid,
            in_specs=[
                q_spec, kv_spec, kv_spec,                   # q, k, v
                full2(D, H * dk), full2(1, H * dk),         # Wq, bq (fused)
                full2(D, H * dk), full2(1, H * dk),         # Wk, bk
                full2(D, H * dk), full2(1, H * dk),         # Wv, bv
                full2(H * dk, D), full2(1, D),              # Wo (fused), bo
                full2(1, D), full2(1, D),                   # gamma, beta
            ],
            out_specs=q_spec,
        ),
        compiler_params=pltpu.CompilerParams(
            dimension_semantics=("parallel", "parallel"),
            vmem_limit_bytes=vmem_limit),
    )(q, k, v, wq_p, bq_p, wk_p, bk_p, wv_p, bv_p, wo_p, bo_p,
      gamma_p, beta_p)


def init_params(key, dim_model, num_heads):
    # Per-head parameters, matching the PyTorch module structure.
    dk = max(dim_model // num_heads, 1)
    keys = jax.random.split(key, 8)
    s_in = 1.0 / (dim_model ** 0.5)
    s_cat = 1.0 / ((num_heads * dk) ** 0.5)
    u = lambda k, shape, s: jax.random.uniform(k, shape, jnp.float32, -s, s)
    return {
        "wq": u(keys[0], (num_heads, dim_model, dk), s_in),
        "bq": u(keys[1], (num_heads, dk), s_in),
        "wk": u(keys[2], (num_heads, dim_model, dk), s_in),
        "bk": u(keys[3], (num_heads, dk), s_in),
        "wv": u(keys[4], (num_heads, dim_model, dk), s_in),
        "bv": u(keys[5], (num_heads, dk), s_in),
        "wo": u(keys[6], (num_heads * dk, dim_model), s_cat),
        "bo": u(keys[7], (dim_model,), s_cat),
        "gamma": jnp.ones((dim_model,), jnp.float32),
        "beta": jnp.zeros((dim_model,), jnp.float32),
    }


def reference(q, k, v, p, matmul_dtype=jnp.float32):
    # Pure-JAX reference of the PyTorch forward (eval mode). `matmul_dtype`
    # mirrors the kernel's bf16 MXU-operand precision (f32 accumulation).
    H, D, dk = p["wq"].shape
    cast = lambda x: x.astype(matmul_dtype)
    heads = []
    for h in range(H):
        qh = jnp.einsum("bsd,de->bse", cast(q), cast(p["wq"][h]),
                        preferred_element_type=jnp.float32) + p["bq"][h]
        kh = jnp.einsum("bsd,de->bse", cast(k), cast(p["wk"][h]),
                        preferred_element_type=jnp.float32) + p["bk"][h]
        vh = jnp.einsum("bsd,de->bse", cast(v), cast(p["wv"][h]),
                        preferred_element_type=jnp.float32) + p["bv"][h]
        s = jnp.einsum("bqe,bke->bqk", cast(qh), cast(kh),
                       preferred_element_type=jnp.float32) / (dk ** 0.5)
        a = jax.nn.softmax(s, axis=-1)
        heads.append(jnp.einsum("bqk,bke->bqe", cast(a), cast(vh),
                                preferred_element_type=jnp.float32))
    cat = jnp.concatenate(heads, axis=-1)
    mha = jnp.einsum("bse,ed->bsd", cast(cat), cast(p["wo"]),
                     preferred_element_type=jnp.float32) + p["bo"]
    x = q + mha
    mean = jnp.mean(x, axis=-1, keepdims=True)
    var = jnp.mean((x - mean) ** 2, axis=-1, keepdims=True)
    return (x - mean) / jnp.sqrt(var + 1e-5) * p["gamma"] + p["beta"]


if __name__ == "__main__":
    B, S, dim_model, num_heads = 2, 8, 128, 4
    key = jax.random.PRNGKey(0)
    kq, kk, kv, kp = jax.random.split(key, 4)
    q = jax.random.normal(kq, (B, S, dim_model), jnp.float32)
    k = jax.random.normal(kk, (B, S, dim_model), jnp.float32)
    v = jax.random.normal(kv, (B, S, dim_model), jnp.float32)
    params = init_params(kp, dim_model, num_heads)

    out = jax.block_until_ready(attention_layer(q, k, v, params))

    # Reference mirrors the kernel's bf16 matmul-operand precision; remaining
    # differences are the approx reciprocal / accumulation order (small).
    ref = reference(q, k, v, params, matmul_dtype=jnp.bfloat16)
    assert out.shape == (B, S, dim_model)
    assert jnp.allclose(out, ref, atol=2e-2, rtol=2e-2), \
        float(jnp.max(jnp.abs(out - ref)))
    print("KERNEL_OK")
</pallas_src>

<mosaic_0001>
module attributes {stable_mosaic.version = 11 : i64} {
  func.func @attention_layer_kernel(%arg0: i32, %arg1: i32, %arg2: memref<1x8x128xf32, #tpu.memory_space<vmem>>, %arg3: memref<1x8x128xf32, #tpu.memory_space<vmem>>, %arg4: memref<1x8x128xf32, #tpu.memory_space<vmem>>, %arg5: memref<128x128xbf16, #tpu.memory_space<vmem>>, %arg6: memref<1x128xf32, #tpu.memory_space<vmem>>, %arg7: memref<128x128xbf16, #tpu.memory_space<vmem>>, %arg8: memref<1x128xf32, #tpu.memory_space<vmem>>, %arg9: memref<128x128xbf16, #tpu.memory_space<vmem>>, %arg10: memref<1x128xf32, #tpu.memory_space<vmem>>, %arg11: memref<128x128xbf16, #tpu.memory_space<vmem>>, %arg12: memref<1x128xf32, #tpu.memory_space<vmem>>, %arg13: memref<1x128xf32, #tpu.memory_space<vmem>>, %arg14: memref<1x128xf32, #tpu.memory_space<vmem>>, %arg15: memref<1x8x128xf32, #tpu.memory_space<vmem>>) attributes {dimension_semantics = [#tpu.dimension_semantics<parallel>, #tpu.dimension_semantics<parallel>], iteration_bounds = array<i64: 2, 1>, scalar_prefetch = 0 : i64, scratch_operands = 0 : i64, tpu.core_type = #tpu.core_type<tc>, window_params = [{transform_indices = @transform_0, window_bounds = array<i64: 1, 8, 128>}, {transform_indices = @transform_1, window_bounds = array<i64: 1, 8, 128>}, {transform_indices = @transform_2, window_bounds = array<i64: 1, 8, 128>}, {pipeline_mode = #tpu.pipeline_mode<synchronous>, transform_indices = @transform_3, window_bounds = array<i64: 128, 128>}, {pipeline_mode = #tpu.pipeline_mode<synchronous>, transform_indices = @transform_4, window_bounds = array<i64: 1, 128>}, {pipeline_mode = #tpu.pipeline_mode<synchronous>, transform_indices = @transform_5, window_bounds = array<i64: 128, 128>}, {pipeline_mode = #tpu.pipeline_mode<synchronous>, transform_indices = @transform_6, window_bounds = array<i64: 1, 128>}, {pipeline_mode = #tpu.pipeline_mode<synchronous>, transform_indices = @transform_7, window_bounds = array<i64: 128, 128>}, {pipeline_mode = #tpu.pipeline_mode<synchronous>, transform_indices = @transform_8, window_bounds = array<i64: 1, 128>}, {pipeline_mode = #tpu.pipeline_mode<synchronous>, transform_indices = @transform_9, window_bounds = array<i64: 128, 128>}, {pipeline_mode = #tpu.pipeline_mode<synchronous>, transform_indices = @transform_10, window_bounds = array<i64: 1, 128>}, {pipeline_mode = #tpu.pipeline_mode<synchronous>, transform_indices = @transform_11, window_bounds = array<i64: 1, 128>}, {pipeline_mode = #tpu.pipeline_mode<synchronous>, transform_indices = @transform_12, window_bounds = array<i64: 1, 128>}, {transform_indices = @transform_13, window_bounds = array<i64: 1, 8, 128>}]} {
    %c0 = arith.constant 0 : index
    %c0_0 = arith.constant 0 : index
    %c0_1 = arith.constant 0 : index
    %0 = vector.load %arg2[%c0, %c0_0, %c0_1] : memref<1x8x128xf32, #tpu.memory_space<vmem>>, vector<1x8x128xf32>
    %1 = vector.shape_cast %0 : vector<1x8x128xf32> to vector<8x128xf32>
    %2 = arith.truncf %1 : vector<8x128xf32> to vector<8x128xbf16>
    %c0_2 = arith.constant 0 : index
    %c0_3 = arith.constant 0 : index
    %c0_4 = arith.constant 0 : index
    %3 = vector.load %arg3[%c0_2, %c0_3, %c0_4] : memref<1x8x128xf32, #tpu.memory_space<vmem>>, vector<1x8x128xf32>
    %4 = vector.shape_cast %3 : vector<1x8x128xf32> to vector<8x128xf32>
    %5 = arith.truncf %4 : vector<8x128xf32> to vector<8x128xbf16>
    %c0_5 = arith.constant 0 : index
    %c0_6 = arith.constant 0 : index
    %c0_7 = arith.constant 0 : index
    %6 = vector.load %arg4[%c0_5, %c0_6, %c0_7] : memref<1x8x128xf32, #tpu.memory_space<vmem>>, vector<1x8x128xf32>
    %7 = vector.shape_cast %6 : vector<1x8x128xf32> to vector<8x128xf32>
    %8 = arith.truncf %7 : vector<8x128xf32> to vector<8x128xbf16>
    %c0_8 = arith.constant 0 : index
    %c0_9 = arith.constant 0 : index
    %9 = vector.load %arg5[%c0_8, %c0_9] : memref<128x128xbf16, #tpu.memory_space<vmem>>, vector<128x128xbf16>
    %cst = arith.constant dense<0.000000e+00> : vector<8x128xf32>
    %10 = tpu.matmul %2, %9, %cst {dimension_numbers = #tpu.dot_dimension_numbers<[1], [0], [0], [1], [0, 0, 1, 1], [], []>} : vector<8x128xbf16>, vector<128x128xbf16>, vector<8x128xf32> -> vector<8x128xf32>
    %c0_10 = arith.constant 0 : index
    %c0_11 = arith.constant 0 : index
    %11 = vector.load %arg6[%c0_10, %c0_11] : memref<1x128xf32, #tpu.memory_space<vmem>>, vector<1x128xf32>
    %12 = vector.broadcast %11 : vector<1x128xf32> to vector<8x128xf32>
    %13 = arith.addf %10, %12 : vector<8x128xf32>
    %14 = arith.truncf %13 : vector<8x128xf32> to vector<8x128xbf16>
    %15 = vector.shape_cast %14 : vector<8x128xbf16> to vector<1x8x128xbf16>
    %c0_12 = arith.constant 0 : index
    %c0_13 = arith.constant 0 : index
    %16 = vector.load %arg7[%c0_12, %c0_13] : memref<128x128xbf16, #tpu.memory_space<vmem>>, vector<128x128xbf16>
    %cst_14 = arith.constant dense<0.000000e+00> : vector<8x128xf32>
    %17 = tpu.matmul %5, %16, %cst_14 {dimension_numbers = #tpu.dot_dimension_numbers<[1], [0], [0], [1], [0, 0, 1, 1], [], []>} : vector<8x128xbf16>, vector<128x128xbf16>, vector<8x128xf32> -> vector<8x128xf32>
    %c0_15 = arith.constant 0 : index
    %c0_16 = arith.constant 0 : index
    %18 = vector.load %arg8[%c0_15, %c0_16] : memref<1x128xf32, #tpu.memory_space<vmem>>, vector<1x128xf32>
    %19 = vector.broadcast %18 : vector<1x128xf32> to vector<8x128xf32>
    %20 = arith.addf %17, %19 : vector<8x128xf32>
    %21 = arith.truncf %20 : vector<8x128xf32> to vector<8x128xbf16>
    %22 = vector.shape_cast %21 : vector<8x128xbf16> to vector<1x8x128xbf16>
    %c0_17 = arith.constant 0 : index
    %c0_18 = arith.constant 0 : index
    %23 = vector.load %arg9[%c0_17, %c0_18] : memref<128x128xbf16, #tpu.memory_space<vmem>>, vector<128x128xbf16>
    %cst_19 = arith.constant dense<0.000000e+00> : vector<8x128xf32>
    %24 = tpu.matmul %8, %23, %cst_19 {dimension_numbers = #tpu.dot_dimension_numbers<[1], [0], [0], [1], [0, 0, 1, 1], [], []>} : vector<8x128xbf16>, vector<128x128xbf16>, vector<8x128xf32> -> vector<8x128xf32>
    %c0_20 = arith.constant 0 : index
    %c0_21 = arith.constant 0 : index
    %25 = vector.load %arg10[%c0_20, %c0_21] : memref<1x128xf32, #tpu.memory_space<vmem>>, vector<1x128xf32>
    %26 = vector.broadcast %25 : vector<1x128xf32> to vector<8x128xf32>
    %27 = arith.addf %24, %26 : vector<8x128xf32>
    %28 = arith.truncf %27 : vector<8x128xf32> to vector<8x128xbf16>
    %29 = vector.shape_cast %28 : vector<8x128xbf16> to vector<1x8x128xbf16>
    %30 = vector.extract_strided_slice %15 {offsets = [0, 0, 0], sizes = [1, 8, 32], strides = [1, 1, 1]} : vector<1x8x128xbf16> to vector<1x8x32xbf16>
    %31 = vector.extract_strided_slice %22 {offsets = [0, 0, 0], sizes = [1, 8, 32], strides = [1, 1, 1]} : vector<1x8x128xbf16> to vector<1x8x32xbf16>
    %32 = vector.extract_strided_slice %29 {offsets = [0, 0, 0], sizes = [1, 8, 32], strides = [1, 1, 1]} : vector<1x8x128xbf16> to vector<1x8x32xbf16>
    %cst_22 = arith.constant dense<0.000000e+00> : vector<1x8x8xf32>
    %33 = tpu.matmul %30, %31, %cst_22 {dimension_numbers = #tpu.dot_dimension_numbers<[2], [2], [1], [1], [0, 0, 0, 1, 1, 1], [0], [0]>} : vector<1x8x32xbf16>, vector<1x8x32xbf16>, vector<1x8x8xf32> -> vector<1x8x8xf32>
    %cst_23 = arith.constant 0.176776692 : f32
    %34 = vector.broadcast %cst_23 : f32 to vector<1x8x8xf32>
    %35 = arith.mulf %33, %34 : vector<1x8x8xf32>
    %cst_24 = arith.constant dense<0xFF800000> : vector<1x8xf32>
    %36 = vector.multi_reduction <maximumf>, %35, %cst_24 [2] : vector<1x8x8xf32> to vector<1x8xf32>
    %37 = vector.shape_cast %36 : vector<1x8xf32> to vector<1x8x1xf32>
    %38 = vector.broadcast %37 : vector<1x8x1xf32> to vector<1x8x8xf32>
    %39 = arith.subf %35, %38 : vector<1x8x8xf32>
    %40 = math.exp %39 : vector<1x8x8xf32>
    %cst_25 = arith.constant dense<0.000000e+00> : vector<1x8xf32>
    %41 = vector.multi_reduction <add>, %40, %cst_25 [2] : vector<1x8x8xf32> to vector<1x8xf32>
    %42 = vector.shape_cast %41 : vector<1x8xf32> to vector<1x8x1xf32>
    %43 = tpu.reciprocal %42 {approx = true} : vector<1x8x1xf32> -> vector<1x8x1xf32>
    %44 = vector.broadcast %43 : vector<1x8x1xf32> to vector<1x8x8xf32>
    %45 = arith.mulf %40, %44 : vector<1x8x8xf32>
    %46 = arith.truncf %45 : vector<1x8x8xf32> to vector<1x8x8xbf16>
    %cst_26 = arith.constant dense<0.000000e+00> : vector<1x8x32xf32>
    %47 = tpu.matmul %46, %32, %cst_26 {dimension_numbers = #tpu.dot_dimension_numbers<[2], [1], [1], [2], [0, 0, 0, 1, 1, 2], [0], [0]>} : vector<1x8x8xbf16>, vector<1x8x32xbf16>, vector<1x8x32xf32> -> vector<1x8x32xf32>
    %48 = arith.truncf %47 : vector<1x8x32xf32> to vector<1x8x32xbf16>
    %49 = vector.extract_strided_slice %15 {offsets = [0, 0, 32], sizes = [1, 8, 32], strides = [1, 1, 1]} : vector<1x8x128xbf16> to vector<1x8x32xbf16>
    %50 = vector.extract_strided_slice %22 {offsets = [0, 0, 32], sizes = [1, 8, 32], strides = [1, 1, 1]} : vector<1x8x128xbf16> to vector<1x8x32xbf16>
    %51 = vector.extract_strided_slice %29 {offsets = [0, 0, 32], sizes = [1, 8, 32], strides = [1, 1, 1]} : vector<1x8x128xbf16> to vector<1x8x32xbf16>
    %cst_27 = arith.constant dense<0.000000e+00> : vector<1x8x8xf32>
    %52 = tpu.matmul %49, %50, %cst_27 {dimension_numbers = #tpu.dot_dimension_numbers<[2], [2], [1], [1], [0, 0, 0, 1, 1, 1], [0], [0]>} : vector<1x8x32xbf16>, vector<1x8x32xbf16>, vector<1x8x8xf32> -> vector<1x8x8xf32>
    %cst_28 = arith.constant 0.176776692 : f32
    %53 = vector.broadcast %cst_28 : f32 to vector<1x8x8xf32>
    %54 = arith.mulf %52, %53 : vector<1x8x8xf32>
    %cst_29 = arith.constant dense<0xFF800000> : vector<1x8xf32>
    %55 = vector.multi_reduction <maximumf>, %54, %cst_29 [2] : vector<1x8x8xf32> to vector<1x8xf32>
    %56 = vector.shape_cast %55 : vector<1x8xf32> to vector<1x8x1xf32>
    %57 = vector.broadcast %56 : vector<1x8x1xf32> to vector<1x8x8xf32>
    %58 = arith.subf %54, %57 : vector<1x8x8xf32>
    %59 = math.exp %58 : vector<1x8x8xf32>
    %cst_30 = arith.constant dense<0.000000e+00> : vector<1x8xf32>
    %60 = vector.multi_reduction <add>, %59, %cst_30 [2] : vector<1x8x8xf32> to vector<1x8xf32>
    %61 = vector.shape_cast %60 : vector<1x8xf32> to vector<1x8x1xf32>
    %62 = tpu.reciprocal %61 {approx = true} : vector<1x8x1xf32> -> vector<1x8x1xf32>
    %63 = vector.broadcast %62 : vector<1x8x1xf32> to vector<1x8x8xf32>
    %64 = arith.mulf %59, %63 : vector<1x8x8xf32>
    %65 = arith.truncf %64 : vector<1x8x8xf32> to vector<1x8x8xbf16>
    %cst_31 = arith.constant dense<0.000000e+00> : vector<1x8x32xf32>
    %66 = tpu.matmul %65, %51, %cst_31 {dimension_numbers = #tpu.dot_dimension_numbers<[2], [1], [1], [2], [0, 0, 0, 1, 1, 2], [0], [0]>} : vector<1x8x8xbf16>, vector<1x8x32xbf16>, vector<1x8x32xf32> -> vector<1x8x32xf32>
    %67 = arith.truncf %66 : vector<1x8x32xf32> to vector<1x8x32xbf16>
    %68 = vector.extract_strided_slice %15 {offsets = [0, 0, 64], sizes = [1, 8, 32], strides = [1, 1, 1]} : vector<1x8x128xbf16> to vector<1x8x32xbf16>
    %69 = vector.extract_strided_slice %22 {offsets = [0, 0, 64], sizes = [1, 8, 32], strides = [1, 1, 1]} : vector<1x8x128xbf16> to vector<1x8x32xbf16>
    %70 = vector.extract_strided_slice %29 {offsets = [0, 0, 64], sizes = [1, 8, 32], strides = [1, 1, 1]} : vector<1x8x128xbf16> to vector<1x8x32xbf16>
    %cst_32 = arith.constant dense<0.000000e+00> : vector<1x8x8xf32>
    %71 = tpu.matmul %68, %69, %cst_32 {dimension_numbers = #tpu.dot_dimension_numbers<[2], [2], [1], [1], [0, 0, 0, 1, 1, 1], [0], [0]>} : vector<1x8x32xbf16>, vector<1x8x32xbf16>, vector<1x8x8xf32> -> vector<1x8x8xf32>
    %cst_33 = arith.constant 0.176776692 : f32
    %72 = vector.broadcast %cst_33 : f32 to vector<1x8x8xf32>
    %73 = arith.mulf %71, %72 : vector<1x8x8xf32>
    %cst_34 = arith.constant dense<0xFF800000> : vector<1x8xf32>
    %74 = vector.multi_reduction <maximumf>, %73, %cst_34 [2] : vector<1x8x8xf32> to vector<1x8xf32>
    %75 = vector.shape_cast %74 : vector<1x8xf32> to vector<1x8x1xf32>
    %76 = vector.broadcast %75 : vector<1x8x1xf32> to vector<1x8x8xf32>
    %77 = arith.subf %73, %76 : vector<1x8x8xf32>
    %78 = math.exp %77 : vector<1x8x8xf32>
    %cst_35 = arith.constant dense<0.000000e+00> : vector<1x8xf32>
    %79 = vector.multi_reduction <add>, %78, %cst_35 [2] : vector<1x8x8xf32> to vector<1x8xf32>
    %80 = vector.shape_cast %79 : vector<1x8xf32> to vector<1x8x1xf32>
    %81 = tpu.reciprocal %80 {approx = true} : vector<1x8x1xf32> -> vector<1x8x1xf32>
    %82 = vector.broadcast %81 : vector<1x8x1xf32> to vector<1x8x8xf32>
    %83 = arith.mulf %78, %82 : vector<1x8x8xf32>
    %84 = arith.truncf %83 : vector<1x8x8xf32> to vector<1x8x8xbf16>
    %cst_36 = arith.constant dense<0.000000e+00> : vector<1x8x32xf32>
    %85 = tpu.matmul %84, %70, %cst_36 {dimension_numbers = #tpu.dot_dimension_numbers<[2], [1], [1], [2], [0, 0, 0, 1, 1, 2], [0], [0]>} : vector<1x8x8xbf16>, vector<1x8x32xbf16>, vector<1x8x32xf32> -> vector<1x8x32xf32>
    %86 = arith.truncf %85 : vector<1x8x32xf32> to vector<1x8x32xbf16>
    %87 = vector.extract_strided_slice %15 {offsets = [0, 0, 96], sizes = [1, 8, 32], strides = [1, 1, 1]} : vector<1x8x128xbf16> to vector<1x8x32xbf16>
    %88 = vector.extract_strided_slice %22 {offsets = [0, 0, 96], sizes = [1, 8, 32], strides = [1, 1, 1]} : vector<1x8x128xbf16> to vector<1x8x32xbf16>
    %89 = vector.extract_strided_slice %29 {offsets = [0, 0, 96], sizes = [1, 8, 32], strides = [1, 1, 1]} : vector<1x8x128xbf16> to vector<1x8x32xbf16>
    %cst_37 = arith.constant dense<0.000000e+00> : vector<1x8x8xf32>
    %90 = tpu.matmul %87, %88, %cst_37 {dimension_numbers = #tpu.dot_dimension_numbers<[2], [2], [1], [1], [0, 0, 0, 1, 1, 1], [0], [0]>} : vector<1x8x32xbf16>, vector<1x8x32xbf16>, vector<1x8x8xf32> -> vector<1x8x8xf32>
    %cst_38 = arith.constant 0.176776692 : f32
    %91 = vector.broadcast %cst_38 : f32 to vector<1x8x8xf32>
    %92 = arith.mulf %90, %91 : vector<1x8x8xf32>
    %cst_39 = arith.constant dense<0xFF800000> : vector<1x8xf32>
    %93 = vector.multi_reduction <maximumf>, %92, %cst_39 [2] : vector<1x8x8xf32> to vector<1x8xf32>
    %94 = vector.shape_cast %93 : vector<1x8xf32> to vector<1x8x1xf32>
    %95 = vector.broadcast %94 : vector<1x8x1xf32> to vector<1x8x8xf32>
    %96 = arith.subf %92, %95 : vector<1x8x8xf32>
    %97 = math.exp %96 : vector<1x8x8xf32>
    %cst_40 = arith.constant dense<0.000000e+00> : vector<1x8xf32>
    %98 = vector.multi_reduction <add>, %97, %cst_40 [2] : vector<1x8x8xf32> to vector<1x8xf32>
    %99 = vector.shape_cast %98 : vector<1x8xf32> to vector<1x8x1xf32>
    %100 = tpu.reciprocal %99 {approx = true} : vector<1x8x1xf32> -> vector<1x8x1xf32>
    %101 = vector.broadcast %100 : vector<1x8x1xf32> to vector<1x8x8xf32>
    %102 = arith.mulf %97, %101 : vector<1x8x8xf32>
    %103 = arith.truncf %102 : vector<1x8x8xf32> to vector<1x8x8xbf16>
    %cst_41 = arith.constant dense<0.000000e+00> : vector<1x8x32xf32>
    %104 = tpu.matmul %103, %89, %cst_41 {dimension_numbers = #tpu.dot_dimension_numbers<[2], [1], [1], [2], [0, 0, 0, 1, 1, 2], [0], [0]>} : vector<1x8x8xbf16>, vector<1x8x32xbf16>, vector<1x8x32xf32> -> vector<1x8x32xf32>
    %105 = arith.truncf %104 : vector<1x8x32xf32> to vector<1x8x32xbf16>
    %106 = tpu.concatenate %48, %67, %86, %105 in 2 : vector<1x8x32xbf16>, vector<1x8x32xbf16>, vector<1x8x32xbf16>, vector<1x8x32xbf16> -> vector<1x8x128xbf16>
    %107 = vector.shape_cast %106 : vector<1x8x128xbf16> to vector<8x128xbf16>
    %c0_42 = arith.constant 0 : index
    %c0_43 = arith.constant 0 : index
    %108 = vector.load %arg11[%c0_42, %c0_43] : memref<128x128xbf16, #tpu.memory_space<vmem>>, vector<128x128xbf16>
    %cst_44 = arith.constant dense<0.000000e+00> : vector<8x128xf32>
    %109 = tpu.matmul %107, %108, %cst_44 {dimension_numbers = #tpu.dot_dimension_numbers<[1], [0], [0], [1], [0, 0, 1, 1], [], []>} : vector<8x128xbf16>, vector<128x128xbf16>, vector<8x128xf32> -> vector<8x128xf32>
    %110 = arith.addf %1, %109 : vector<8x128xf32>
    %c0_45 = arith.constant 0 : index
    %c0_46 = arith.constant 0 : index
    %111 = vector.load %arg12[%c0_45, %c0_46] : memref<1x128xf32, #tpu.memory_space<vmem>>, vector<1x128xf32>
    %112 = vector.broadcast %111 : vector<1x128xf32> to vector<8x128xf32>
    %113 = arith.addf %110, %112 : vector<8x128xf32>
    %cst_47 = arith.constant dense<0.000000e+00> : vector<8xf32>
    %114 = vector.multi_reduction <add>, %113, %cst_47 [1] : vector<8x128xf32> to vector<8xf32>
    %115 = vector.shape_cast %114 : vector<8xf32> to vector<8x1xf32>
    %cst_48 = arith.constant 1.280000e+02 : f32
    %116 = vector.broadcast %cst_48 : f32 to vector<8x1xf32>
    %117 = arith.divf %115, %116 : vector<8x1xf32>
    %118 = vector.broadcast %117 : vector<8x1xf32> to vector<8x128xf32>
    %119 = arith.subf %113, %118 : vector<8x128xf32>
    %120 = arith.mulf %119, %119 : vector<8x128xf32>
    %cst_49 = arith.constant dense<0.000000e+00> : vector<8xf32>
    %121 = vector.multi_reduction <add>, %120, %cst_49 [1] : vector<8x128xf32> to vector<8xf32>
    %122 = vector.shape_cast %121 : vector<8xf32> to vector<8x1xf32>
    %cst_50 = arith.constant 1.280000e+02 : f32
    %123 = vector.broadcast %cst_50 : f32 to vector<8x1xf32>
    %124 = arith.divf %122, %123 : vector<8x1xf32>
    %cst_51 = arith.constant 9.99999974E-6 : f32
    %125 = vector.broadcast %cst_51 : f32 to vector<8x1xf32>
    %126 = arith.addf %124, %125 : vector<8x1xf32>
    %127 = math.rsqrt %126 : vector<8x1xf32>
    %128 = vector.broadcast %127 : vector<8x1xf32> to vector<8x128xf32>
    %129 = arith.mulf %119, %128 : vector<8x128xf32>
    %c0_52 = arith.constant 0 : index
    %c0_53 = arith.constant 0 : index
    %130 = vector.load %arg13[%c0_52, %c0_53] : memref<1x128xf32, #tpu.memory_space<vmem>>, vector<1x128xf32>
    %131 = vector.broadcast %130 : vector<1x128xf32> to vector<8x128xf32>
    %132 = arith.mulf %129, %131 : vector<8x128xf32>
    %c0_54 = arith.constant 0 : index
    %c0_55 = arith.constant 0 : index
    %133 = vector.load %arg14[%c0_54, %c0_55] : memref<1x128xf32, #tpu.memory_space<vmem>>, vector<1x128xf32>
    %134 = vector.broadcast %133 : vector<1x128xf32> to vector<8x128xf32>
    %135 = arith.addf %132, %134 : vector<8x128xf32>
    %136 = vector.shape_cast %135 : vector<8x128xf32> to vector<1x8x128xf32>
    %c0_56 = arith.constant 0 : index
    %c0_57 = arith.constant 0 : index
    %c0_58 = arith.constant 0 : index
    %137 = vector.load %arg15[%c0_56, %c0_57, %c0_58] : memref<1x8x128xf32, #tpu.memory_space<vmem>>, vector<1x8x128xf32>
    tpu.vector_store %arg15[%c0_56, %c0_57, %c0_58], %136 {strides = array<i32>} : memref<1x8x128xf32, #tpu.memory_space<vmem>>, vector<1x8x128xf32>,
    return
  }
  func.func @transform_0(%arg0: i32, %arg1: i32) -> (i32, i32, i32) {
    %c0_i32 = arith.constant 0 : i32
    %c0_i32_0 = arith.constant 0 : i32
    return %arg0, %arg1, %c0_i32 : i32, i32, i32
  }
  func.func @transform_1(%arg0: i32, %arg1: i32) -> (i32, i32, i32) {
    %c0_i32 = arith.constant 0 : i32
    %c0_i32_0 = arith.constant 0 : i32
    %c0_i32_1 = arith.constant 0 : i32
    return %arg0, %c0_i32, %c0_i32_0 : i32, i32, i32
  }
  func.func @transform_2(%arg0: i32, %arg1: i32) -> (i32, i32, i32) {
    %c0_i32 = arith.constant 0 : i32
    %c0_i32_0 = arith.constant 0 : i32
    %c0_i32_1 = arith.constant 0 : i32
    return %arg0, %c0_i32, %c0_i32_0 : i32, i32, i32
  }
  func.func @transform_3(%arg0: i32, %arg1: i32) -> (i32, i32) {
    %c0_i32 = arith.constant 0 : i32
    %c0_i32_0 = arith.constant 0 : i32
    %c0_i32_1 = arith.constant 0 : i32
    return %c0_i32, %c0_i32_0 : i32, i32
  }
  func.func @transform_4(%arg0: i32, %arg1: i32) -> (i32, i32) {
    %c0_i32 = arith.constant 0 : i32
    %c0_i32_0 = arith.constant 0 : i32
    %c0_i32_1 = arith.constant 0 : i32
    return %c0_i32, %c0_i32_0 : i32, i32
  }
  func.func @transform_5(%arg0: i32, %arg1: i32) -> (i32, i32) {
    %c0_i32 = arith.constant 0 : i32
    %c0_i32_0 = arith.constant 0 : i32
    %c0_i32_1 = arith.constant 0 : i32
    return %c0_i32, %c0_i32_0 : i32, i32
  }
  func.func @transform_6(%arg0: i32, %arg1: i32) -> (i32, i32) {
    %c0_i32 = arith.constant 0 : i32
    %c0_i32_0 = arith.constant 0 : i32
    %c0_i32_1 = arith.constant 0 : i32
    return %c0_i32, %c0_i32_0 : i32, i32
  }
  func.func @transform_7(%arg0: i32, %arg1: i32) -> (i32, i32) {
    %c0_i32 = arith.constant 0 : i32
    %c0_i32_0 = arith.constant 0 : i32
    %c0_i32_1 = arith.constant 0 : i32
    return %c0_i32, %c0_i32_0 : i32, i32
  }
  func.func @transform_8(%arg0: i32, %arg1: i32) -> (i32, i32) {
    %c0_i32 = arith.constant 0 : i32
    %c0_i32_0 = arith.constant 0 : i32
    %c0_i32_1 = arith.constant 0 : i32
    return %c0_i32, %c0_i32_0 : i32, i32
  }
  func.func @transform_9(%arg0: i32, %arg1: i32) -> (i32, i32) {
    %c0_i32 = arith.constant 0 : i32
    %c0_i32_0 = arith.constant 0 : i32
    %c0_i32_1 = arith.constant 0 : i32
    return %c0_i32, %c0_i32_0 : i32, i32
  }
  func.func @transform_10(%arg0: i32, %arg1: i32) -> (i32, i32) {
    %c0_i32 = arith.constant 0 : i32
    %c0_i32_0 = arith.constant 0 : i32
    %c0_i32_1 = arith.constant 0 : i32
    return %c0_i32, %c0_i32_0 : i32, i32
  }
  func.func @transform_11(%arg0: i32, %arg1: i32) -> (i32, i32) {
    %c0_i32 = arith.constant 0 : i32
    %c0_i32_0 = arith.constant 0 : i32
    %c0_i32_1 = arith.constant 0 : i32
    return %c0_i32, %c0_i32_0 : i32, i32
  }
  func.func @transform_12(%arg0: i32, %arg1: i32) -> (i32, i32) {
    %c0_i32 = arith.constant 0 : i32
    %c0_i32_0 = arith.constant 0 : i32
    %c0_i32_1 = arith.constant 0 : i32
    return %c0_i32, %c0_i32_0 : i32, i32
  }
  func.func @transform_13(%arg0: i32, %arg1: i32) -> (i32, i32, i32) {
    %c0_i32 = arith.constant 0 : i32
    %c0_i32_0 = arith.constant 0 : i32
    return %arg0, %arg1, %c0_i32 : i32, i32, i32
  }
}

</mosaic_0001>

<bundles_post_ra>
// kernel: tpu_custom_call.1
= control target key start
LH: loop header
LB: loop body
LE: loop exit
PB: predicated region body
PF: predicated region fallthrough
CT: control target
= control target key end

     0   :  { %s3066_s0 = inlined_call_operand.hbm [shape: f32[2,8,128], index: 0, kind: input, shape index: {}]   ;;  %s3067_s1 = inlined_call_operand.hbm [shape: f32[2,8,128], index: 1, kind: input, shape index: {}]   ;;  %s3068_s2 = inlined_call_operand.hbm [shape: f32[2,8,128], index: 2, kind: input, shape index: {}]   ;;  %s3069_s3 = inlined_call_operand.hbm [shape: bf16[128,128], index: 3, kind: input, shape index: {}]   ;;  %s3070_s4 = inlined_call_operand.vmem [shape: f32[1,128], index: 4, kind: input, shape index: {}]   ;;  %s3071_s5 = inlined_call_operand.hbm [shape: bf16[128,128], index: 5, kind: input, shape index: {}]   ;;  %s3072_s6 = inlined_call_operand.vmem [shape: f32[1,128], index: 6, kind: input, shape index: {}]   ;;  %s3073_s7 = inlined_call_operand.hbm [shape: bf16[128,128], index: 7, kind: input, shape index: {}]   ;;  %s3074_s8 = inlined_call_operand.vmem [shape: f32[1,128], index: 8, kind: input, shape index: {}]   ;;  %s3075_s9 = inlined_call_operand.hbm [shape: bf16[128,128], index: 9, kind: input, shape index: {}]   ;;  %s3076_s10 = inlined_call_operand.vmem [shape: f32[1,128], index: 10, kind: input, shape index: {}]   ;;  %s3077_s11 = inlined_call_operand.vmem [shape: f32[1,128], index: 11, kind: input, shape index: {}]   ;;  %s3078_s12 = inlined_call_operand.vmem [shape: f32[1,128], index: 12, kind: input, shape index: {}]   ;;  %s3079_s13 = inlined_call_operand.hbm [shape: f32[2,8,128], index: 13, kind: output, shape index: {}]  }
   0x1   :  { %3106 = sst [smem:[#allocation28_spill]] %s3067_s1 }
   0x2   :  { %3107 = sst [smem:[#allocation29_spill]] %s3069_s3 }
   0x3   :  { %3108 = sst [smem:[#allocation30_spill]] %s3073_s7 }
   0x4   :  { %3109 = sst [smem:[#allocation31_spill]] %s3074_s8 }
   0x5   :  { %3110 = sst [smem:[#allocation32_spill]] %s3076_s10 }
   0x6   :  { %3111 = sst [smem:[#allocation33_spill]] %s3077_s11 }
   0x7   :  { %3112 = sst [smem:[#allocation34_spill]] %s3078_s12 }
   0x8   :  { %3113 = sst [smem:[#allocation35_spill]] %s3079_s13 }
   0x9   :  { %18 = vsyncpa [#allocation3], 0 }
   0xa   :  { %20 = vsyncpa [#allocation3 + $0x1], 0 }
   0xb   :  { %21 = vsyncpa [#allocation6], 0 }
   0xc   :  { %23 = vsyncpa [#allocation6 + $0x1], 0 }
   0xd   :  { %24 = vsyncpa [#allocation9], 0 }
   0xe   :  { %25 = vsyncpa [#allocation12], 0 }
   0xf   :  { %26 = vsyncpa [#allocation4], 0 }
  0x10   :  { %28 = vsyncpa [#allocation4 + $0x1], 0  ;;  %s2536_s25 = smov 0   ;;  %s2538_s26 = smov 0  }
  0x11   :  { %s2540_s27 = smov 0   ;;  %s2542_s28 = smov 0  }
  0x12   :  { %s2544_s29 = smov 0   ;;  %s2546_s30 = smov 0  }
  0x13 LB: > { %3114 = sst [smem:[#allocation20_spill]] %s2429_s25  ;;  %s2567_s14 = sadd.s32 4294967295, %s2449_s30   ;;  %s2449_s30 = sphi %s2546_s30, %s34_s30   ;;  %s2445_s29 = sphi %s2544_s29, %s3163_s29   ;;  %s2441_s28 = sphi %s2542_s28, %s3162_s28   ;;  %s2437_s27 = sphi %s2540_s27, %s3166_s27   ;;  %s2433_s26 = sphi %s2538_s26, %s3165_s26   ;;  %s2429_s25 = sphi %s2536_s25, %s3164_s25  }
  0x14   : > { %3115 = sst [smem:[#allocation21_spill]] %s2441_s28  ;;  %p1732_p0 = scmp.ge.s32.totalorder %s2449_s30, 1 }
  0x15   : > { %3116 = sst [smem:[#allocation22_spill]] %s2445_s29  ;;  %p3090_p1 = scmp.eq.s32.totalorder %s2567_s14, 0 }
  0x16   : > { %3117 = sst [smem:[#allocation23_spill]] %s2449_s30  ;;  %p369_p2 = scmp.lt.s32.totalorder %s2449_s30, 3 }
  0x17   : > { %s2451_s16 = smov [#allocation8]   ;;  %s2452_s19 = smov [#allocation11]  }
  0x18   : > { %p2572_p3 = pnand %p1732_p0, %p369_p2  ;;  %s381_s17 = sshll.u32 %s2451_s16, 4  ;;  %s2576_s17 = int_to_ptr.vmem [resolvable:$true] %s381_s17 }
  0x19   : > { %s413_s20 = sshll.u32 %s2452_s19, 4  ;;  %s3120_s3 = sld [smem:[#allocation29_spill]]  ;;  %s2587_s20 = int_to_ptr.vmem [resolvable:$true] %s413_s20 }
  0x1a   : > { %s3118_s15 = scalar_select %p2572_p3, 1, 0 }
  0x1b   : > { %p2007_p4 = pneg %p2572_p3 }
  0x1d   : > { %p2583_p6 = pnand %p2007_p4, %p3090_p1 }
  0x1f   : > { %s3119_s18 = scalar_select %p2583_p6, 1, 0 }
  0x20   : > { %s2153_s23 = scalar_lea.hbm %s3120_s3, 1024  ;;  %p2597_p8 = pneg %p2583_p6 }
  0x21   : > { %p2154_p7 = scmp.ne.s32.totalorder %s3120_s3, %s2153_s23  ;;  %p2160_p11 = scmp.lt.u32.totalorder %s2153_s23, %s3120_s3 }
  0x22   : > { %s3121_s13 = scalar_select %p2597_p8, 1, 0 }
  0x23   : > { %p2156_p9 = pnand %p2597_p8, %p2154_p7 }
  0x25   : > { %p2157_p10 = pneg %p2156_p9 }
  0x27   : > { %p2162_p12 = pnand %p2160_p11, %p2157_p10 }
  0x29   : > { %2165 = shalt.err (!%p2162_p12)
}
  0x2a   : > { %s2166_s21 = scalar_lea.vmem %s2576_s17, 1024  ;;  %p2174_p4 = scmp.lt.s32.totalorder %s2576_s17, %s2576_s17 }
  0x2b   : > { %p2167_p13 = scmp.ne.s32.totalorder %s2576_s17, %s2166_s21  ;;  %p2175_p5 = scmp.lt.s32.totalorder %s2166_s21, %s2166_s21 }
  0x2d   : > { %p2169_p0 = pnand %p2167_p13, %p2597_p8  ;;  %p2176_p7 = por %p2175_p5, %p2174_p4 }
  0x2f   : > { %p2170_p2 = pneg %p2169_p0 }
  0x31   : > { %p2177_p9 = pnand %p2176_p7, %p2170_p2 }
  0x33   : > { %2180 = shalt.err (!%p2177_p9)
}
  0x34   : > { %s3081_s22 = smov 64   ;;  %s3083_s12 = smov 4  }
  0x35   : > { %2010 = dma.hbm_to_vmem [thread:$0]  (!%p2583_p6), %s3120_s3, 1024, %s2576_s17, [#allocation9], %s3081_s22, %s3081_s22, %s3083_s12  }
  0x36   : > { %s3122_s7 = sld [smem:[#allocation30_spill]] }
  0x3c   : > { %s2181_s21 = scalar_lea.hbm %s3122_s7, 1024 }
  0x3d   : > { %p2182_p5 = scmp.ne.s32.totalorder %s3122_s7, %s2181_s21  ;;  %p2188_p12 = scmp.lt.u32.totalorder %s2181_s21, %s3122_s7 }
  0x3f   : > { %p2184_p10 = pnand %p2182_p5, %p2597_p8 }
  0x41   : > { %p2185_p11 = pneg %p2184_p10 }
  0x43   : > { %p2190_p13 = pnand %p2188_p12, %p2185_p11 }
  0x45   : > { %2193 = shalt.err (!%p2190_p13)
}
  0x46   : > { %s2194_s17 = scalar_lea.vmem %s2587_s20, 1024  ;;  %p2202_p7 = scmp.lt.s32.totalorder %s2587_s20, %s2587_s20 }
  0x47   : > { %p2195_p0 = scmp.ne.s32.totalorder %s2587_s20, %s2194_s17  ;;  %p2203_p9 = scmp.lt.s32.totalorder %s2194_s17, %s2194_s17 }
  0x49   : > { %p2197_p2 = pnand %p2195_p0, %p2597_p8  ;;  %p2204_p5 = por %p2203_p9, %p2202_p7 }
  0x4b   : > { %p2198_p4 = pneg %p2197_p2 }
  0x4d   : > { %p2205_p10 = pnand %p2204_p5, %p2198_p4 }
  0x4f   : > { %2208 = shalt.err (!%p2205_p10)
}
  0x50   : > { %2016 = dma.hbm_to_vmem [thread:$0]  (!%p2583_p6), %s3122_s7, 1024, %s2587_s20, [#allocation12], %s3081_s22, %s3081_s22, %s3083_s12  }
  0x51   : > { %s1731_s11 = sadd.s32 4294967294, %s2449_s30   ;;  %s46_s28 = sadd.s32 1, %s2445_s29 }
  0x52   : > { %p48_p11 = scmp.ge.s32.totalorder %s46_s28, 2  ;;  %s55_s23 = sadd.s32 1, %s2437_s27 }
  0x53   : > { %p62_p12 = scmp.ne.s32.totalorder %s2437_s27, %s2433_s26  ;;  %p63_p13 = scmp.eq.s32.totalorder %s2449_s30, 0 }
  0x54   : > { %s3168_s28 = smov (%p48_p11, %s46_s28), 0  ;;  %p68_p2 = scmp.ne.s32.totalorder %s2433_s26, %s2429_s25 }
  0x55   : > { %3123 = sst [smem:[#allocation24_spill]] %s3168_s28  ;;  %p2655_p0 = por %p63_p13, %p62_p12 }
  0x56   : > { %s50_s20 = ssub.s32 %s2445_s29, %s3168_s28  ;;  %p356_p4 = scmp.eq.s32.totalorder %s2567_s14, 1 }
  0x57   : > { %p53_p7 = scmp.eq.s32.totalorder %s50_s20, 0  ;;  %p2666_p9 = por %p3090_p1, %p68_p2 }
  0x58   : > { %p2670_p5 = por %p356_p4, %p62_p12  ;;  %p362_p10 = scmp.eq.s32.totalorder %s1731_s11, 1 }
  0x59   : > { %s3125_s16 = scalar_select %p2666_p9, 1, 0 }
  0x5a   : > { %s3126_s19 = scalar_select %p2670_p5, 1, 0 }
  0x5b   : > { %s2675_s21 = scalar_select %p53_p7, %s2437_s27, %s55_s23  }
  0x5c   : > { %3127 = sst [smem:[#allocation25_spill]] %s3126_s19  ;;  %p2677_p11 = por %p362_p10, %p68_p2 }
  0x5d   : > { %3128 = sst [smem:[#allocation26_spill]] %s2675_s21  ;;  %p2038_p13 = scmp.lt.s32.totalorder %s2449_s30, 2 }
  0x5e   : > { %s3129_s17 = scalar_select %p2677_p11, 1, 0 }
  0x5f   : > { %s3085_s8 = sand.u32 1, %s2437_s27   ;;  %s2684_s10 = sshll.u32 %s2445_s29, 7 }
  0x60   : > { %3130 = sst [smem:[#allocation27_spill]] %s3129_s17  ;;  %s2688_s20 = sshll.u32 %s3085_s8, 3 }
  0x61   : > { %p2692_p12 = pnand %p2038_p13, %p2655_p0  ;;  %s471_s11 = sand.u32 1, %s2449_s30  }
  0x62   : > { %s3132_s1 = sld [smem:[#allocation28_spill]]  ;;  %s475_s7 = scalar_lea.vmem [#allocation5], %s2688_s20 }
  0x63   : > { %s3131_s22 = scalar_select %p2692_p12, 1, 0 }
  0x64   : > { %s482_s8 = sshll.u32 %s475_s7, 4  ;;  %s2706_s24 = scalar_lea.sflag [#allocation6], %s471_s11  ;;  %s2704_s8 = int_to_ptr.vmem [resolvable:$true] %s482_s8 }
  0x65   : > { %p2712_p2 = pneg %p2692_p12 }
  0x67   : > { %s3133_s29 = scalar_select %p2712_p2, 1, 0 }
  0x68   : > { %s2701_s3 = scalar_lea.hbm %s3132_s1, %s2684_s10  ;;  %s2214_s21 = scalar_lea.hbm %s3132_s1, 256 }
  0x69   : > { %s2209_s28 = scalar_lea.hbm %s2701_s3, 128  ;;  %p2215_p10 = scmp.lt.u32.totalorder %s2701_s3, %s3132_s1 }
  0x6a   : > { %p2210_p0 = scmp.ne.s32.totalorder %s2701_s3, %s2209_s28  ;;  %p2216_p13 = scmp.lt.u32.totalorder %s2214_s21, %s2209_s28 }
  0x6b   : > { %p2218_p11 = scmp.lt.u32.totalorder %s2209_s28, %s2701_s3 }
  0x6c   : > { %p2212_p4 = pnand %p2712_p2, %p2210_p0  ;;  %p2217_p1 = por %p2216_p13, %p2215_p10 }
  0x6e   : > { %p2213_p7 = pneg %p2212_p4  ;;  %p2219_p5 = por %p2218_p11, %p2217_p1 }
  0x70   : > { %p2220_p9 = pnand %p2219_p5, %p2213_p7 }
  0x72   : > { %2223 = shalt.err (!%p2220_p9)
}
  0x73   : > { %s2224_s11 = scalar_lea.vmem %s2704_s8, 128  ;;  %s2455_s12 = smov [#allocation5]  }
  0x74   : > { %p2225_p0 = scmp.ne.s32.totalorder %s2704_s8, %s2224_s11  ;;  %s2229_s23 = sshll.u32 %s2455_s12, 4  ;;  %s2230_s23 = int_to_ptr.vmem [resolvable:$false] %s2229_s23 }
  0x75   : > { %s2231_s30 = scalar_lea.vmem %s2230_s23, 256  ;;  %p2232_p6 = scmp.lt.s32.totalorder %s2704_s8, %s2230_s23 }
  0x76   : > { %p2227_p4 = pnand %p2225_p0, %p2712_p2  ;;  %p2233_p8 = scmp.lt.s32.totalorder %s2231_s30, %s2224_s11 }
  0x78   : > { %p2228_p3 = pneg %p2227_p4  ;;  %p2234_p10 = por %p2233_p8, %p2232_p6 }
  0x7a   : > { %p2235_p13 = pnand %p2234_p10, %p2228_p3 }
  0x7c   : > { %2238 = shalt.err (!%p2235_p13)
}
  0x7d   : > { %2026 = dma.hbm_to_vmem [thread:$0]  (!%p2692_p12), %s2701_s3, 128, %s2704_s8, %s2706_s24  }
  0x7e   : > { %s2456_s28 = smov [#allocation10]   ;;  %s2457_s7 = smov [#allocation13]  }
  0x7f   : > { %s397_s21 = sshll.u32 %s2456_s28, 4  ;;  %s429_s1 = sshll.u32 %s2457_s7, 4  ;;  %s398_s21 = int_to_ptr.vmem [resolvable:$true] %s397_s21  ;;  %s430_s1 = int_to_ptr.vmem [resolvable:$true] %s429_s1 }
  0x80   : > { %s2239_s23 = scalar_lea.hbm %s3071_s5, 1024  ;;  %p3134_p3 = scmp.ne.s32.totalorder %s3121_s13, 0 }
  0x81   : > { %p2240_p1 = scmp.ne.s32.totalorder %s3071_s5, %s2239_s23  ;;  %p2246_p9 = scmp.lt.u32.totalorder %s2239_s23, %s3071_s5 }
  0x83   : > { %p2242_p6 = pnand %p2240_p1, %p3134_p3 }
  0x85   : > { %p2243_p8 = pneg %p2242_p6 }
  0x87   : > { %p2248_p5 = pnand %p2246_p9, %p2243_p8 }
  0x89   : > { %2251 = shalt.err (!%p2248_p5)
}
  0x8a   : > { %s2252_s3 = scalar_lea.vmem %s398_s21, 1024  ;;  %p2260_p4 = scmp.lt.s32.totalorder %s398_s21, %s398_s21 }
  0x8b   : > { %p2253_p11 = scmp.ne.s32.totalorder %s398_s21, %s2252_s3  ;;  %p2261_p10 = scmp.lt.s32.totalorder %s2252_s3, %s2252_s3 }
  0x8d   : > { %p2255_p7 = pnand %p2253_p11, %p3134_p3  ;;  %p2262_p13 = por %p2261_p10, %p2260_p4 }
  0x8f   : > { %p2256_p0 = pneg %p2255_p7 }
  0x91   : > { %p2263_p12 = pnand %p2262_p13, %p2256_p0 }
  0x93   : > { %2266 = shalt.err (!%p2263_p12)
}
  0x94   : > { %p3135_p1 = scmp.ne.s32.totalorder %s3119_s18, 0  ;;  %s3136_s17 = smov 4  }
  0x95   : > { %s3137_s8 = smov 64   ;;  %s2267_s12 = scalar_lea.hbm %s3075_s9, 1024 }
  0x96   : > { %2013 = dma.hbm_to_vmem [thread:$0]  (!%p3135_p1), %s3071_s5, 1024, %s398_s21, [#allocation9], %s3137_s8, %s3137_s8, %s3136_s17  }
  0x97   : > { %p2268_p6 = scmp.ne.s32.totalorder %s3075_s9, %s2267_s12  ;;  %p2274_p9 = scmp.lt.u32.totalorder %s2267_s12, %s3075_s9 }
  0x99   : > { %p2270_p12 = pnand %p2268_p6, %p3134_p3 }
  0x9b   : > { %p2271_p8 = pneg %p2270_p12 }
  0x9d   : > { %p2276_p5 = pnand %p2274_p9, %p2271_p8 }
  0x9f   : > { %2279 = shalt.err (!%p2276_p5)
}
  0xa0   : > { %s2280_s25 = scalar_lea.vmem %s430_s1, 1024  ;;  %p2288_p4 = scmp.lt.s32.totalorder %s430_s1, %s430_s1 }
  0xa1   : > { %p2281_p11 = scmp.ne.s32.totalorder %s430_s1, %s2280_s25  ;;  %p2289_p10 = scmp.lt.s32.totalorder %s2280_s25, %s2280_s25 }
  0xa3   : > { %p2283_p7 = pnand %p2281_p11, %p3134_p3  ;;  %p2290_p13 = por %p2289_p10, %p2288_p4 }
  0xa5   : > { %p2284_p0 = pneg %p2283_p7 }
  0xa7   : > { %p2291_p2 = pnand %p2290_p13, %p2284_p0 }
  0xa9   : > { %2294 = shalt.err (!%p2291_p2)
}
  0xaa   : > { %2019 = dma.hbm_to_vmem [thread:$0]  (!%p3135_p1), %s3075_s9, 1024, %s430_s1, [#allocation12], %s3137_s8, %s3137_s8, %s3136_s17  }
  0xab   : > { %s2782_s7 = scalar_lea.hbm %s3066_s0, %s2684_s10  ;;  %s456_s18 = scalar_lea.vmem [#allocation2], %s2688_s20 }
  0xac   : > { %s464_s12 = sshll.u32 %s456_s18, 4  ;;  %s2791_s30 = scalar_lea.hbm %s3068_s2, %s2684_s10  ;;  %s2785_s12 = int_to_ptr.vmem [resolvable:$true] %s464_s12 }
  0xad   : > { %s3138_s3 = sand.u32 1, %s2437_s27   ;;  %s2295_s17 = scalar_lea.hbm %s2782_s7, 128 }
  0xae   : > { %s453_s1 = scalar_lea.sflag [#allocation3], %s3138_s3  ;;  %p2296_p2 = scmp.ne.s32.totalorder %s2782_s7, %s2295_s17 }
  0xaf   : > { %p3139_p3 = scmp.ne.s32.totalorder %s3133_s29, 0  ;;  %s2300_s21 = scalar_lea.hbm %s3066_s0, 256 }
  0xb0   : > { %p2301_p12 = scmp.lt.u32.totalorder %s2782_s7, %s3066_s0  ;;  %p2302_p8 = scmp.lt.u32.totalorder %s2300_s21, %s2295_s17 }
  0xb1   : > { %p2298_p1 = pnand %p2296_p2, %p3139_p3  ;;  %p2304_p5 = scmp.lt.u32.totalorder %s2295_s17, %s2782_s7 }
  0xb2   : > { %p2303_p9 = por %p2302_p8, %p2301_p12 }
  0xb3   : > { %p2299_p6 = pneg %p2298_p1 }
  0xb4   : > { %p2305_p11 = por %p2304_p5, %p2303_p9 }
  0xb6   : > { %p2306_p7 = pnand %p2305_p11, %p2299_p6 }
  0xb8   : > { %2309 = shalt.err (!%p2306_p7)
}
  0xb9   : > { %s2310_s10 = scalar_lea.vmem %s2785_s12, 128  ;;  %s2458_s28 = smov [#allocation2]  }
  0xba   : > { %p2311_p0 = scmp.ne.s32.totalorder %s2785_s12, %s2310_s10  ;;  %s2315_s18 = sshll.u32 %s2458_s28, 4  ;;  %s2316_s18 = int_to_ptr.vmem [resolvable:$false] %s2315_s18 }
  0xbb   : > { %s2317_s23 = scalar_lea.vmem %s2316_s18, 256  ;;  %p2318_p13 = scmp.lt.s32.totalorder %s2785_s12, %s2316_s18 }
  0xbc   : > { %p2313_p4 = pnand %p2311_p0, %p3139_p3  ;;  %p2319_p2 = scmp.lt.s32.totalorder %s2317_s23, %s2310_s10 }
  0xbe   : > { %p2314_p10 = pneg %p2313_p4  ;;  %p2320_p1 = por %p2319_p2, %p2318_p13 }
  0xc0   : > { %p2321_p12 = pnand %p2320_p1, %p2314_p10 }
  0xc2   : > { %2324 = shalt.err (!%p2321_p12)
}
  0xc3   : > { %p3140_p6 = scmp.ne.s32.totalorder %s3131_s22, 0  ;;  %s493_s11 = scalar_lea.vmem [#allocation7], %s2688_s20 }
  0xc4   : > { %s500_s3 = sshll.u32 %s493_s11, 4  ;;  %s2325_s17 = scalar_lea.hbm %s2791_s30, 128  ;;  %s501_s3 = int_to_ptr.vmem [resolvable:$true] %s500_s3 }
  0xc5   : > { %2023 = dma.hbm_to_vmem [thread:$0]  (!%p3140_p6), %s2782_s7, 128, %s2785_s12, %s453_s1  }
  0xc6   : > { %p2326_p8 = scmp.ne.s32.totalorder %s2791_s30, %s2325_s17  ;;  %s2330_s21 = scalar_lea.hbm %s3068_s2, 256 }
  0xc7   : > { %p2331_p11 = scmp.lt.u32.totalorder %s2791_s30, %s3068_s2  ;;  %p2332_p7 = scmp.lt.u32.totalorder %s2330_s21, %s2325_s17 }
  0xc8   : > { %p2328_p9 = pnand %p2326_p8, %p3139_p3  ;;  %p2334_p4 = scmp.lt.u32.totalorder %s2325_s17, %s2791_s30 }
  0xc9   : > { %p2333_p0 = por %p2332_p7, %p2331_p11 }
  0xca   : > { %p2329_p5 = pneg %p2328_p9 }
  0xcb   : > { %p2335_p10 = por %p2334_p4, %p2333_p0 }
  0xcd   : > { %p2336_p13 = pnand %p2335_p10, %p2329_p5 }
  0xcf   : > { %2339 = shalt.err (!%p2336_p13)
}
  0xd0   : > { %s2340_s20 = scalar_lea.vmem %s501_s3, 128  ;;  %s2459_s7 = smov [#allocation7]  }
  0xd1   : > { %p2341_p2 = scmp.ne.s32.totalorder %s501_s3, %s2340_s20  ;;  %s2345_s12 = sshll.u32 %s2459_s7, 4  ;;  %s2346_s12 = int_to_ptr.vmem [resolvable:$false] %s2345_s12 }
  0xd2   : > { %s2347_s1 = scalar_lea.vmem %s2346_s12, 256  ;;  %p2348_p8 = scmp.lt.s32.totalorder %s501_s3, %s2346_s12 }
  0xd3   : > { %p2343_p1 = pnand %p2341_p2, %p3139_p3  ;;  %p2349_p9 = scmp.lt.s32.totalorder %s2347_s1, %s2340_s20 }
  0xd5   : > { %p2344_p12 = pneg %p2343_p1  ;;  %p2350_p6 = por %p2349_p9, %p2348_p8 }
  0xd7   : > { %p2351_p7 = pnand %p2350_p6, %p2344_p12 }
  0xd9   : > { %2354 = shalt.err (!%p2351_p7)
}
  0xda   : > { %p3141_p11 = scmp.ne.s32.totalorder %s3131_s22, 0  ;;  %p3142_p5 = scmp.ne.s32.totalorder %s3118_s15, 0 }
  0xdb   : > { %s2838_s29 = sand.u32 (!%p3142_p5), 1, %s2433_s26   ;;  %p3143_p3 = scmp.ne.s32.totalorder (!%p3142_p5), %s3125_s16, 0 }
  0xdc   : > { %2029 = dma.hbm_to_vmem [thread:$0]  (!%p3141_p11), %s2791_s30, 128, %s501_s3, %s2706_s24  }
  0xdd   : > { %509 = sbr.rel (%p3142_p5) target bundleno = 3512 (0xdb8), region = 72  ;;  %s2841_s10 = sshll.u32 (!%p3142_p5), %s2838_s29, 3 }
  0xde   : > { %s512_s28 = scalar_lea.sflag (!%p3142_p5), [#allocation3], %s2838_s29  ;;  %s515_s18 = scalar_lea.vmem (!%p3142_p5), [#allocation2], %s2841_s10 }
  0xe4   : > { %2408 = dma.done.wait (%p3143_p3), %s512_s28, 128  }
  0xe5   : > { %2410 = vsyncadd (%p3143_p3), %s512_s28, 4294967168  ;;  %s520_s15 = sand.u32 1, %s2567_s14   ;;  %s524_s24 = scalar_lea.vmem [#allocation5], %s2841_s10 }
  0xe6   : > { %s521_s22 = scalar_lea.sflag [#allocation6], %s520_s15 }
  0xe7   : > { %2412 = dma.done.wait (%p3143_p3), %s521_s22, 256  }
  0xe8   : > { %2414 = vsyncadd (%p3143_p3), %s521_s22, 4294967040  ;;  %s533_s30 = scalar_lea.vmem [#allocation7], %s2841_s10  ;;  %p3144_p6 = scmp.eq.s32.totalorder %s2567_s14, 0 }
  0xea   : > { %2416 = dma.done.wait (%p3144_p6), [#allocation9], 2048   ;;  %p3145_p0 = pmov %p3144_p6 }
  0xec   : > { %2418 = vsyncadd (%p3145_p0), [#allocation9], 4294965248  ;;  %p3146_p4 = pmov %p3145_p0 }
  0xed   : > { %p3147_p10 = pmov %p3145_p0 }
  0xee   : > { %2420 = dma.done.wait (%p3146_p4), [#allocation12], 2048  }
  0xef   : > { %2422 = vsyncadd (%p3147_p10), [#allocation12], 4294965248  ;;  %v2460_v0 = vmov 0.0   ;;  %vm2461_vm0 = vmmov 0   ;;  %v2103_v1 = vld [vmem:[#allocation10] sm:$0xff]   ;;  %v2104_v2 = vld [vmem:[#allocation10 + $0x8] sm:$0xff]  }
  0xf0   : > { %1875 = vmatprep.subr.bf16.mxu1 %v2460_v0  ;;  %1855 = vmatprep.subr.bf16.mxu0 %v2460_v0  ;;  %v2105_v3 = vld [vmem:[#allocation8] sm:$0xff]   ;;  %v2107_v4 = vld [vmem:[#allocation8 + $0x8] sm:$0xff]   ;;  %v2106_v5 = vld [vmem:[#allocation10 + $0x10] sm:$0xff]   ;;  %vm945_vm1 = vcmask 261120   ;;  %s2462_s3 = smov 96   ;;  %vm993_vm2 = vcmask 64512  }
  0xf1   : > { %1891 = vmatprep.mubr.msk.bf16.mxu1 %vm2461_vm0, %v2460_v0  ;;  %1871 = vmatprep.mubr.msk.bf16.mxu0 %vm2461_vm0, %v2460_v0  ;;  %v2109_v6 = vld [vmem:[#allocation8 + $0x10] sm:$0xff]   ;;  %v2108_v7 = vld [vmem:[#allocation10 + $0x18] sm:$0xff]   ;;  %v2110_v9 = vld [vmem:[#allocation10 + $0x20] sm:$0xff]   ;;  %s3148_s25 = sld [smem:[#allocation31_spill]]  ;;  %vm1009_vm3 = vcmask 1043456   ;;  %s2463_s21 = smov 64  }
  0xf2   : > { %1876 = vmatpush3.bf16.msra.mxu1 %v2103_v1  ;;  %1856 = vmatpush3.bf16.msra.mxu0 %v2105_v3  ;;  %v2111_v8 = vld [vmem:[#allocation8 + $0x18] sm:$0xff]   ;;  %v2112_v10 = vld [vmem:[#allocation10 + $0x28] sm:$0xff]   ;;  %v2113_v11 = vld [vmem:[#allocation8 + $0x20] sm:$0xff]   ;;  %s2464_s19 = smov 32   ;;  %vm1405_vm4 = vcmask 523264   ;;  %vm1408_vm5 = vcmask 785408  }
  0xf3   : > { %1877 = vmatprep.subr.bf16.mxu1 %v2460_v0  ;;  %1857 = vmatprep.subr.bf16.mxu0 %v2460_v0  ;;  %v2115_v12 = vld [vmem:[#allocation8 + $0x28] sm:$0xff]   ;;  %v2114_v13 = vld [vmem:[#allocation10 + $0x30] sm:$0xff]   ;;  %v2116_v15 = vld [vmem:[#allocation10 + $0x38] sm:$0xff]   ;;  %s3149_s7 = sld [smem:[#allocation32_spill]]  ;;  %s3151_s1 = sld [smem:[#allocation25_spill]] }
  0xf4   : > { %v2117_v14 = vld [vmem:[#allocation8 + $0x30] sm:$0xff]   ;;  %v605_v16 = vld [vmem:[%s524_s24] sm:$0xff]  ;;  %v2118_v17 = vld [vmem:[#allocation8 + $0x38] sm:$0xff]   ;;  %s3150_s12 = sld [smem:[#allocation21_spill]]  ;;  %s3152_s15 = sld [smem:[#allocation33_spill]] }
  0xf5   : > { %v2887_v18 = vld [vmem:[%s515_s18] sm:$0xff]  ;;  %v606_v19 = vpack.c.bf16 %v605_v16, %v605_v16  ;;  %v2119_v36 = vld [vmem:[#allocation11] sm:$0xff]   ;;  %v2120_v37 = vld [vmem:[#allocation11 + $0x8] sm:$0xff]   ;;  %s601_s16 = scalar_lea.vmem [#allocation14], %s2841_s10  ;;  %s3154_s17 = sld [smem:[#allocation35_spill]] }
  0xf6   : > { %1878 = vmatpush3.bf16.msra.mxu1 %v2104_v2  ;;  %1858 = vmatpush3.bf16.msra.mxu0 %v2107_v4  ;;  %v604_v20 = vpack.c.bf16 %v2887_v18, %v2887_v18  ;;  %v1762_v21 = vld [vmem:[%s3072_s6] ss:$0 sm:$0xff]  ;;  %v2122_v39 = vld [vmem:[#allocation11 + $0x18] sm:$0xff]   ;;  %v2123_v40 = vld [vmem:[#allocation11 + $0x20] sm:$0xff]   ;;  %s1569_s23 = sshll.u32 %s601_s16, 4  ;;  %s2465_s10 = smov [#allocation14]   ;;  %s3019_s23 = int_to_ptr.vmem [resolvable:$true] %s1569_s23 }
  0xf7   : > { %1879 = vmatprep.subr.bf16.mxu1 %v2460_v0  ;;  %1859 = vmatprep.subr.bf16.mxu0 %v2460_v0  ;;  %v1753_v23 = vld [vmem:[%s3070_s4] ss:$0 sm:$0xff]  ;;  %v2124_v41 = vld [vmem:[#allocation11 + $0x28] sm:$0xff]   ;;  %v2126_v43 = vld [vmem:[#allocation11 + $0x38] sm:$0xff]  }
  0xf8   : > { %v2121_v38 = vld [vmem:[#allocation11 + $0x10] sm:$0xff]  }
  0xf9   : > { %v2125_v42 = vld [vmem:[#allocation11 + $0x30] sm:$0xff]   ;;  %p3155_p2 = scmp.ne.s32.totalorder %s3151_s1, 0 }
  0xfa   : > { %1880 = vmatpush3.bf16.msra.mxu1 %v2106_v5  ;;  %1860 = vmatpush3.bf16.msra.mxu0 %v2109_v6  ;;  %v607_v44 = vld [vmem:[%s533_s30] sm:$0xff]  ;;  %s3153_s30 = sld [smem:[#allocation34_spill]]  ;;  %s1800_s14 = sshll.u32 %s3150_s12, 7 }
  0xfb   : > { %1881 = vmatprep.subr.bf16.mxu1 %v2460_v0  ;;  %1861 = vmatprep.subr.bf16.mxu0 %v2460_v0  ;;  %v608_v45 = vpack.c.bf16 %v607_v44, %v607_v44  ;;  %v1771_v61 = vld [vmem:[%s3148_s25] ss:$0 sm:$0xff]  ;;  %s3017_s8 = scalar_lea.hbm %s3154_s17, %s1800_s14  ;;  %s1555_s25 = scalar_lea.sflag [#allocation4], %s2838_s29 }
  0xfe   : > { %1882 = vmatpush3.bf16.msra.mxu1 %v2108_v7  ;;  %1862 = vmatpush3.bf16.msra.mxu0 %v2111_v8 }
  0xff   : > { %1883 = vmatprep.subr.bf16.mxu1 %v2460_v0  ;;  %1863 = vmatprep.subr.bf16.mxu0 %v2460_v0 }
 0x102   : > { %1884 = vmatpush3.bf16.msra.mxu1 %v2110_v9  ;;  %1864 = vmatpush3.bf16.msra.mxu0 %v2113_v11 }
 0x103   : > { %1885 = vmatprep.subr.bf16.mxu1 %v2460_v0  ;;  %1865 = vmatprep.subr.bf16.mxu0 %v2460_v0 }
 0x106   : > { %1886 = vmatpush3.bf16.msra.mxu1 %v2112_v10  ;;  %1866 = vmatpush3.bf16.msra.mxu0 %v2115_v12 }
 0x107   : > { %1887 = vmatprep.subr.bf16.mxu1 %v2460_v0  ;;  %1867 = vmatprep.subr.bf16.mxu0 %v2460_v0 }
 0x10a   : > { %1888 = vmatpush3.bf16.msra.mxu1 %v2114_v13  ;;  %1868 = vmatpush3.bf16.msra.mxu0 %v2117_v14 }
 0x10b   : > { %1889 = vmatprep.subr.bf16.mxu1 %v2460_v0  ;;  %1869 = vmatprep.subr.bf16.mxu0 %v2460_v0 }
 0x10e   : > { %1890 = vmatpush3.bf16.msra.mxu1 %v2116_v15  ;;  %1870 = vmatpush3.bf16.msra.mxu0 %v2118_v17 }
 0x10f   : > { %1915 = vmatprep.subr.bf16.mxu1 %v2460_v0  ;;  %1895 = vmatprep.subr.bf16.mxu0 %v2460_v0 }
 0x111   : > { %1892 = vmatmul.mubr.bf16.vlgmr.msra.gmra.mrb[0].mxu1 %v606_v19  ;;  %1872 = vmatmul.mubr.bf16.vlgmr.msra.gmra.mrb[0].mxu0 %v604_v20 }
 0x112   : > { %1917 = vmatprep.mubr.msk.bf16.mxu1 %vm2461_vm0, %v2460_v0  ;;  %1911 = vmatprep.mubr.msk.bf16.mxu0 %vm2461_vm0, %v2460_v0 }
 0x113   : > { %1896 = vmatpush3.bf16.msra.mxu0 %v2119_v36 }
 0x114   : > { %1897 = vmatprep.subr.bf16.mxu0 %v2460_v0 }
 0x117   : > { %1898 = vmatpush3.bf16.msra.mxu0 %v2120_v37 }
 0x118   : > { %1899 = vmatprep.subr.bf16.mxu0 %v2460_v0 }
 0x11b   : > { %1900 = vmatpush3.bf16.msra.mxu0 %v2121_v38 }
 0x11c   : > { %1901 = vmatprep.subr.bf16.mxu0 %v2460_v0 }
 0x11f   : > { %1902 = vmatpush3.bf16.msra.mxu0 %v2122_v39 }
 0x120   : > { %1903 = vmatprep.subr.bf16.mxu0 %v2460_v0 }
 0x123   : > { %1904 = vmatpush3.bf16.msra.mxu0 %v2123_v40 }
 0x124   : > { %1905 = vmatprep.subr.bf16.mxu0 %v2460_v0 }
 0x127   : > { %1906 = vmatpush3.bf16.msra.mxu0 %v2124_v41 }
 0x128   : > { %1907 = vmatprep.subr.bf16.mxu0 %v2460_v0 }
 0x12b   : > { %1908 = vmatpush3.bf16.msra.mxu0 %v2125_v42 }
 0x12c   : > { %1909 = vmatprep.subr.bf16.mxu0 %v2460_v0 }
 0x12f   : > { %1910 = vmatpush3.bf16.msra.mxu0 %v2126_v43 }
 0x130   : > { %1963 = vmatprep.subr.bf16.mxu0 %v2460_v0 }
 0x132   : > { %1912 = vmatmul.mubr.bf16.vlgmr.msra.gmra.mrb[4].mxu0 %v608_v45 }
 0x133   : > { %1979 = vmatprep.mubr.msk.bf16.mxu0 %vm2461_vm0, %v2460_v0 }
 0x1e4   : > { %v826_v22 = vpop.f32.mrb[0].mxu1  ;;  %v714_v27 = vpop.f32.mrb[0].mxu0 }
 0x1e5   : > { %v827_v24 = vadd.f32 %v1762_v21, %v826_v22  ;;  %v1893_v25 = vpop.f32.mrb[1].mxu1  ;;  %v715_v30 = vadd.f32 %v1753_v23, %v714_v27  ;;  %v1873_v31 = vpop.f32.mrb[1].mxu0 }
 0x1e6   : > { %v829_v26 = vpop.f32.mrb[2].mxu1  ;;  %v717_v32 = vpop.f32.mrb[2].mxu0 }
 0x1e7   : > { %v2904_v28 = vpack.c.bf16 %v827_v24, %v827_v24  ;;  %v1894_v29 = vpop.f32.mrb[3].mxu1  ;;  %v2908_v33 = vpack.c.bf16 %v715_v30, %v715_v30  ;;  %v1874_v35 = vpop.f32.mrb[3].mxu0 }
 0x1e9   : > { %1058 = vrot.lane.b32.xlu1 %v2904_v28, %s2462_s3  ;;  %v950_v34 = vsel %vm945_vm1, %v2904_v28, 0 }
 0x1ea   : > { %1916 = vmatpush3.bf16.xpose.msra.mxu1 %v950_v34 }
 0x1eb   : > { %1921 = vmatprep.subr.bf16.mxu1 %v2460_v0 }
 0x1ed   : > { %1055 = vrot.lane.b32.xlu1 %v2908_v33, %s2462_s3 }
 0x1f1   : > { %1918 = vmatmul.mubr.msk.bf16.vlgmr.msra.gmra.mrb[4].mxu1 %vm945_vm1, %v2908_v33 }
 0x1f2   : > { %1923 = vmatprep.mubr.msk.bf16.mxu1 %vm2461_vm0, %v2460_v0 }
 0x205   : > { %v938_v52 = vpop.f32.mrb[4].mxu0 }
 0x206   : > { %v1913_v53 = vpop.f32.mrb[5].mxu0  ;;  %v939_v62 = vadd.f32 %v1771_v61, %v938_v52 }
 0x207   : > { %v941_v54 = vpop.f32.mrb[6].mxu0 }
 0x208   : > { %v1914_v55 = vpop.f32.mrb[7].mxu0  ;;  %v2936_v63 = vpack.c.bf16 %v939_v62, %v939_v62 }
 0x20a   : > { %v1011_v1 = vsel %vm1009_vm3, %v2936_v63, 0 }
 0x20b   : > { %1922 = vmatpush3.bf16.msra.mxu1 %v1011_v1 }
 0x20c   : > { %1927 = vmatprep.subr.bf16.mxu1 %v2460_v0 }
 0x25b   : > { %v1059_v5 = vpop.permute.xlu1 %1058 }
 0x25c   : > { %v1064_v7 = vsel %vm945_vm1, %v1059_v5, 0 }
 0x25f   : > { %v1056_v8 = vpop.permute.xlu1 %1055 }
 0x2c4   : > { %v986_v46 = vpop.f32.mrb[4].mxu1 }
 0x2c5   : > { %v992_v47 = vmul.f32 0.17677669, %v986_v46  ;;  %v1919_v48 = vpop.f32.mrb[5].mxu1 }
 0x2c6   : > { %v989_v49 = vpop.f32.mrb[6].mxu1 }
 0x2c7   : > { %v1920_v50 = vpop.f32.mrb[7].mxu1  ;;  %v994_v51 = vsel %vm993_vm2, %v992_v47, -inf }
 0x2c8   : > { %995 = vmax.xlane.f32.xlu0 %v994_v51 }
 0x355   : > { %v996_v56 = vpop.xlane.xlu0 %995 }
 0x356   : > { %v997_v57 = vsub.f32 %v992_v47, %v996_v56 }
 0x358   : > { %v998_v58 = vmul.f32 1.442695, %v997_v57 }
 0x35a   : > { %2135 = vpow2.f32 %v998_v58 }
 0x364   : > { %v2136_v59 = vpop.eup %2135 }
 0x365   : > { %v1000_v60 = vsel %vm993_vm2, %v2136_v59, 0.0 }
 0x366   : > { %1001 = vadd.xlane.f32.xlu0 %v1000_v60 }
 0x3f3   : > { %v1002_v2 = vpop.xlane.xlu0 %1001 }
 0x3f4   : > { %2137 = vrcp.f32 %v1002_v2 }
 0x3fe   : > { %v2138_v3 = vpop.eup %2137 }
 0x3ff   : > { %v1004_v4 = vmul.f32 %v2138_v3, %v2136_v59 }
 0x401   : > { %v1005_v6 = vpack.c.bf16 %v1004_v4, %v1004_v4 }
 0x403   : > { %1924 = vmatmul.mubr.msk.bf16.vlgmr.msra.gmra.mrb[8].mxu1 %vm993_vm2, %v1005_v6 }
 0x404   : > { %1928 = vmatpush3.bf16.xpose.msra.mxu1 %v1064_v7  ;;  %1929 = vmatprep.mubr.msk.bf16.mxu1 %vm2461_vm0, %v2460_v0 }
 0x405   : > { %1933 = vmatprep.subr.bf16.mxu1 %v2460_v0 }
 0x40b   : > { %1930 = vmatmul.mubr.msk.bf16.vlgmr.msra.gmra.mrb[12].mxu1 %vm945_vm1, %v1056_v8 }
 0x40c   : > { %1935 = vmatprep.mubr.msk.bf16.mxu1 %vm2461_vm0, %v2460_v0 }
 0x4d6   : > { %v2949_v9 = vpop.f32.mrb[8].mxu1 }
 0x4d7   : > { %v1925_v10 = vpop.f32.mrb[9].mxu1 }
 0x4d8   : > { %v1050_v11 = vpop.f32.mrb[10].mxu1 }
 0x4d9   : > { %v1926_v12 = vpop.f32.mrb[11].mxu1 }
 0x4de   : > { %v1100_v13 = vpop.f32.mrb[12].mxu1 }
 0x4df   : > { %v1106_v14 = vmul.f32 0.17677669, %v1100_v13  ;;  %v1931_v15 = vpop.f32.mrb[13].mxu1 }
 0x4e0   : > { %v1103_v16 = vpop.f32.mrb[14].mxu1 }
 0x4e1   : > { %v1932_v17 = vpop.f32.mrb[15].mxu1  ;;  %v1107_v19 = vsel %vm993_vm2, %v1106_v14, -inf }
 0x4e2   : > { %1108 = vmax.xlane.f32.xlu0 %v1107_v19 }
 0x4f8   : > { %1120 = vrot.lane.b32.xlu0 %v2936_v63, %s2462_s3 }
 0x4fc   : > { %1171 = vrot.lane.b32.xlu0 %v2904_v28, %s2463_s21 }
 0x500   : > { %1169 = vrot.lane.b32.xlu0 %v2908_v33, %s2463_s21 }
 0x56f   : > { %v1109_v20 = vpop.xlane.xlu0 %1108 }
 0x570   : > { %v1110_v21 = vsub.f32 %v1106_v14, %v1109_v20  ;;  %v2127_v20 = vld [vmem:[#allocation13] sm:$0xff]  }
 0x571   : > { %1964 = vmatpush3.bf16.msra.mxu0 %v2127_v20 }
 0x572   : > { %v1111_v22 = vmul.f32 1.442695, %v1110_v21  ;;  %v2128_v21 = vld [vmem:[#allocation13 + $0x8] sm:$0xff]   ;;  %1965 = vmatprep.subr.bf16.mxu0 %v2460_v0 }
 0x573   : > { %v1121_v23 = vpop.permute.xlu0 %1120 }
 0x574   : > { %2139 = vpow2.f32 %v1111_v22  ;;  %v1126_v24 = vsel %vm1009_vm3, %v1121_v23, 0  ;;  %v2129_v22 = vld [vmem:[#allocation13 + $0x10] sm:$0xff]   ;;  %v2130_v23 = vld [vmem:[#allocation13 + $0x18] sm:$0xff]  }
 0x575   : > { %1934 = vmatpush3.bf16.msra.mxu1 %v1126_v24  ;;  %1966 = vmatpush3.bf16.msra.mxu0 %v2128_v21  ;;  %v2131_v24 = vld [vmem:[#allocation13 + $0x20] sm:$0xff]  }
 0x576   : > { %1939 = vmatprep.subr.bf16.mxu1 %v2460_v0  ;;  %1967 = vmatprep.subr.bf16.mxu0 %v2460_v0 }
 0x577   : > { %v1172_v31 = vpop.permute.xlu0 %1171 }
 0x578   : > { %v1177_v34 = vsel %vm945_vm1, %v1172_v31, 0 }
 0x579   : > { %1968 = vmatpush3.bf16.msra.mxu0 %v2129_v22 }
 0x57a   : > { %1969 = vmatprep.subr.bf16.mxu0 %v2460_v0 }
 0x57b   : > { %v1170_v36 = vpop.permute.xlu0 %1169 }
 0x57d   : > { %1970 = vmatpush3.bf16.msra.mxu0 %v2130_v23 }
 0x57e   : > { %v2140_v25 = vpop.eup %2139  ;;  %1971 = vmatprep.subr.bf16.mxu0 %v2460_v0 }
 0x57f   : > { %v1113_v26 = vsel %vm993_vm2, %v2140_v25, 0.0 }
 0x580   : > { %1114 = vadd.xlane.f32.xlu1 %v1113_v26  ;;  %v2133_v26 = vld [vmem:[#allocation13 + $0x30] sm:$0xff]  }
 0x581   : > { %1972 = vmatpush3.bf16.msra.mxu0 %v2131_v24 }
 0x582   : > { %1973 = vmatprep.subr.bf16.mxu0 %v2460_v0 }
 0x591   : > { %1232 = vrot.lane.b32.xlu1 %v2936_v63, %s2463_s21 }
 0x60d   : > { %v1115_v27 = vpop.xlane.xlu1 %1114 }
 0x60e   : > { %2141 = vrcp.f32 %v1115_v27  ;;  %v2134_v27 = vld [vmem:[#allocation13 + $0x38] sm:$0xff]  }
 0x611   : > { %v1233_v35 = vpop.permute.xlu1 %1232 }
 0x612   : > { %v1238_v37 = vsel %vm1009_vm3, %v1233_v35, 0 }
 0x618   : > { %v2142_v29 = vpop.eup %2141 }
 0x619   : > { %v1117_v30 = vmul.f32 %v2142_v29, %v2140_v25  ;;  %v2132_v25 = vld [vmem:[#allocation13 + $0x28] sm:$0xff]  }
 0x61a   : > { %1974 = vmatpush3.bf16.msra.mxu0 %v2132_v25 }
 0x61b   : > { %v1118_v32 = vpack.c.bf16 %v1117_v30, %v1117_v30  ;;  %1975 = vmatprep.subr.bf16.mxu0 %v2460_v0 }
 0x61d   : > { %1936 = vmatmul.mubr.msk.bf16.vlgmr.msra.gmra.mrb[16].mxu1 %vm993_vm2, %v1118_v32 }
 0x61e   : > { %1940 = vmatpush3.bf16.xpose.msra.mxu1 %v1177_v34  ;;  %1941 = vmatprep.mubr.msk.bf16.mxu1 %vm2461_vm0, %v2460_v0 }
 0x61f   : > { %1945 = vmatprep.subr.bf16.mxu1 %v2460_v0  ;;  %1976 = vmatpush3.bf16.msra.mxu0 %v2133_v26 }
 0x620   : > { %1977 = vmatprep.subr.bf16.mxu0 %v2460_v0 }
 0x623   : > { %1978 = vmatpush3.bf16.msra.mxu0 %v2134_v27 }
 0x625   : > { %1942 = vmatmul.mubr.msk.bf16.vlgmr.msra.gmra.mrb[20].mxu1 %vm945_vm1, %v1170_v36 }
 0x626   : > { %1946 = vmatpush3.bf16.msra.mxu1 %v1238_v37  ;;  %1947 = vmatprep.mubr.msk.bf16.mxu1 %vm2461_vm0, %v2460_v0  ;;  %v1053_v37 = vpack.c.bf16 %v2949_v9, %v2949_v9 }
 0x627   : > { %1951 = vmatprep.subr.bf16.mxu1 %v2460_v0 }
 0x6f0   : > { %v1162_v38 = vpop.f32.mrb[16].mxu1 }
 0x6f1   : > { %v1937_v39 = vpop.f32.mrb[17].mxu1  ;;  %v1168_v6 = vpack.c.bf16 %v1162_v38, %v1162_v38 }
 0x6f2   : > { %v1165_v40 = vpop.f32.mrb[18].mxu1 }
 0x6f3   : > { %v1938_v41 = vpop.f32.mrb[19].mxu1 }
 0x6f8   : > { %v1213_v42 = vpop.f32.mrb[20].mxu1 }
 0x6f9   : > { %v1219_v43 = vmul.f32 0.17677669, %v1213_v42  ;;  %v1943_v44 = vpop.f32.mrb[21].mxu1  ;;  %v1796_v42 = vld [vmem:[%s3149_s7] ss:$0 sm:$0xff] }
 0x6fa   : > { %v1216_v45 = vpop.f32.mrb[22].mxu1 }
 0x6fb   : > { %v1944_v46 = vpop.f32.mrb[23].mxu1  ;;  %v1220_v47 = vsel %vm993_vm2, %v1219_v43, -inf }
 0x6fc   : > { %1221 = vmax.xlane.f32.xlu0 %v1220_v47 }
 0x789   : > { %v1222_v48 = vpop.xlane.xlu0 %1221 }
 0x78a   : > { %v1223_v49 = vsub.f32 %v1219_v43, %v1222_v48 }
 0x78c   : > { %v1224_v50 = vmul.f32 1.442695, %v1223_v49 }
 0x78e   : > { %2143 = vpow2.f32 %v1224_v50 }
 0x798   : > { %v2144_v51 = vpop.eup %2143 }
 0x799   : > { %v1226_v52 = vsel %vm993_vm2, %v2144_v51, 0.0 }
 0x79a   : > { %1227 = vadd.xlane.f32.xlu1 %v1226_v52 }
 0x7ab   : > { %1283 = vrot.lane.b32.xlu1 %v2904_v28, %s2464_s19 }
 0x7af   : > { %1281 = vrot.lane.b32.xlu1 %v2908_v33, %s2464_s19 }
 0x827   : > { %v1228_v53 = vpop.xlane.xlu1 %1227 }
 0x828   : > { %2145 = vrcp.f32 %v1228_v53 }
 0x82b   : > { %v1284_v56 = vpop.permute.xlu1 %1283 }
 0x82c   : > { %v1289_v58 = vsel %vm945_vm1, %v1284_v56, 0  ;;  %v1798_v56 = vld [vmem:[%s3153_s30] ss:$0 sm:$0xff] }
 0x82f   : > { %v1282_v59 = vpop.permute.xlu1 %1281 }
 0x832   : > { %v2146_v54 = vpop.eup %2145 }
 0x833   : > { %v1230_v55 = vmul.f32 %v2146_v54, %v2144_v51 }
 0x835   : > { %v1231_v57 = vpack.c.bf16 %v1230_v55, %v1230_v55 }
 0x837   : > { %1948 = vmatmul.mubr.msk.bf16.vlgmr.msra.gmra.mrb[24].mxu1 %vm993_vm2, %v1231_v57 }
 0x838   : > { %1952 = vmatpush3.bf16.xpose.msra.mxu1 %v1289_v58  ;;  %1953 = vmatprep.mubr.msk.bf16.mxu1 %vm2461_vm0, %v2460_v0 }
 0x839   : > { %1957 = vmatprep.subr.bf16.mxu1 %v2460_v0 }
 0x83f   : > { %1954 = vmatmul.mubr.msk.bf16.vlgmr.msra.gmra.mrb[28].mxu1 %vm945_vm1, %v1282_v59 }
 0x840   : > { %1959 = vmatprep.mubr.msk.bf16.mxu1 %vm2461_vm0, %v2460_v0 }
 0x90a   : > { %v1274_v28 = vpop.f32.mrb[24].mxu1 }
 0x90b   : > { %v1949_v33 = vpop.f32.mrb[25].mxu1  ;;  %v1280_v7 = vpack.c.bf16 %v1274_v28, %v1274_v28 }
 0x90c   : > { %v1277_v60 = vpop.f32.mrb[26].mxu1 }
 0x90d   : > { %v1950_v61 = vpop.f32.mrb[27].mxu1 }
 0x912   : > { %v1325_v62 = vpop.f32.mrb[28].mxu1 }
 0x913   : > { %v1331_v1 = vmul.f32 0.17677669, %v1325_v62  ;;  %v1955_v2 = vpop.f32.mrb[29].mxu1 }
 0x914   : > { %v1328_v3 = vpop.f32.mrb[30].mxu1 }
 0x915   : > { %v1956_v4 = vpop.f32.mrb[31].mxu1  ;;  %v1332_v5 = vsel %vm993_vm2, %v1331_v1, -inf }
 0x916   : > { %1333 = vmax.xlane.f32.xlu0 %v1332_v5 }
 0x92c   : > { %1344 = vrot.lane.b32.xlu0 %v2936_v63, %s2464_s19 }
 0x930   : > { %1394 = vrot.lane.b32.xlu0 %v1168_v6, %s2464_s19  ;;  %s2359_s19 = sshll.u32 %s2465_s10, 4  ;;  %s2360_s19 = int_to_ptr.vmem [resolvable:$false] %s2359_s19 }
 0x931   : > { %s2361_s13 = scalar_lea.vmem %s2360_s19, 256  ;;  %p2362_p8 = scmp.lt.s32.totalorder %s3019_s23, %s2360_s19 }
 0x934   : > { %1397 = vrot.lane.b32.xlu0 %v1280_v7, %s2463_s21  ;;  %s2355_s21 = scalar_lea.vmem %s3019_s23, 128 }
 0x935   : > { %p2356_p13 = scmp.ne.s32.totalorder %s3019_s23, %s2355_s21  ;;  %p2363_p9 = scmp.lt.s32.totalorder %s2361_s13, %s2355_s21 }
 0x937   : > { %p2357_p1 = pnand %p2356_p13, %p3155_p2  ;;  %p2364_p7 = por %p2363_p9, %p2362_p8 }
 0x939   : > { %p2358_p12 = pneg %p2357_p1 }
 0x93b   : > { %p2365_p11 = pnand %p2364_p7, %p2358_p12 }
 0x9a3   : > { %v1334_v8 = vpop.xlane.xlu0 %1333 }
 0x9a4   : > { %v1335_v10 = vsub.f32 %v1331_v1, %v1334_v8 }
 0x9a6   : > { %v1336_v11 = vmul.f32 1.442695, %v1335_v10 }
 0x9a7   : > { %v1345_v12 = vpop.permute.xlu0 %1344 }
 0x9a8   : > { %2147 = vpow2.f32 %v1336_v11  ;;  %v1350_v13 = vsel %vm1009_vm3, %v1345_v12, 0 }
 0x9a9   : > { %1958 = vmatpush3.bf16.msra.mxu1 %v1350_v13 }
 0x9ab   : > { %v1395_v35 = vpop.permute.xlu0 %1394 }
 0x9ac   : > { %v1404_v38 = vsel %vm945_vm1, %v1053_v37, %v1395_v35 }
 0x9af   : > { %v1398_v36 = vpop.permute.xlu0 %1397 }
 0x9b0   : > { %v1407_v39 = vsel %vm1405_vm4, %v1404_v38, %v1398_v36 }
 0x9b2   : > { %v2148_v14 = vpop.eup %2147 }
 0x9b3   : > { %v1338_v15 = vsel %vm993_vm2, %v2148_v14, 0.0 }
 0x9b4   : > { %1339 = vadd.xlane.f32.xlu1 %v1338_v15 }
 0xa41   : > { %v1340_v16 = vpop.xlane.xlu1 %1339 }
 0xa42   : > { %2149 = vrcp.f32 %v1340_v16 }
 0xa4c   : > { %v2150_v63 = vpop.eup %2149 }
 0xa4d   : > { %v1342_v17 = vmul.f32 %v2150_v63, %v2148_v14 }
 0xa4f   : > { %v1343_v19 = vpack.c.bf16 %v1342_v17, %v1342_v17 }
 0xa51   : > { %1960 = vmatmul.mubr.msk.bf16.vlgmr.msra.gmra.mrb[32].mxu1 %vm993_vm2, %v1343_v19 }
 0xb24   : > { %v1386_v29 = vpop.f32.mrb[32].mxu1 }
 0xb25   : > { %v1392_v30 = vpack.c.bf16 %v1386_v29, %v1386_v29  ;;  %v1961_v31 = vpop.f32.mrb[33].mxu1 }
 0xb26   : > { %v1389_v32 = vpop.f32.mrb[34].mxu1 }
 0xb27   : > { %1400 = vrot.lane.b32.xlu0 %v1392_v30, %s2462_s3  ;;  %v1962_v34 = vpop.f32.mrb[35].mxu1 }
 0xb99   : > { %v1401_v40 = vpop.permute.xlu0 %1400 }
 0xb9a   : > { %v1410_v0 = vsel %vm1408_vm5, %v1407_v39, %v1401_v40 }
 0xb9b   : > { %1980 = vmatmul.mubr.bf16.vlgmr.msra.gmra.mrb[8].mxu0 %v1410_v0 }
 0xc6e   : > { %v1510_v41 = vpop.f32.mrb[8].mxu0 }
 0xc6f   : > { %v1516_v43 = vadd.f32 %v1510_v41, %v2887_v18  ;;  %v1981_v44 = vpop.f32.mrb[9].mxu0  ;;  %v1797_v18 = vld [vmem:[%s3152_s15] ss:$0 sm:$0xff] }
 0xc70   : > { %v1513_v45 = vpop.f32.mrb[10].mxu0 }
 0xc71   : > { %v1982_v46 = vpop.f32.mrb[11].mxu0  ;;  %v1524_v9 = vadd.f32 %v1796_v42, %v1516_v43 }
 0xc73   : > { %1525 = vadd.xlane.f32.xlu1 %v1524_v9 }
 0xd00   : > { %v1526_v47 = vpop.xlane.xlu1 %1525 }
 0xd01   : > { %v1528_v48 = vmul.f32 0.0078125, %v1526_v47 }
 0xd03   : > { %v1529_v49 = vsub.f32 %v1524_v9, %v1528_v48 }
 0xd05   : > { %v1530_v50 = vmul.f32 %v1529_v49, %v1529_v49 }
 0xd07   : > { %1531 = vadd.xlane.f32.xlu0 %v1530_v50 }
 0xd94   : > { %v1532_v51 = vpop.xlane.xlu0 %1531 }
 0xd95   : > { %v1533_v52 = vmul.f32 0.0078125, %v1532_v51 }
 0xd97   : > { %v1534_v53 = vadd.f32 1e-05, %v1533_v52 }
 0xd99   : > { %2151 = vrsqrt.f32 %v1534_v53 }
 0xda3   : > { %v2152_v54 = vpop.eup %2151 }
 0xda4   : > { %v1536_v55 = vmul.f32 %v2152_v54, %v1529_v49 }
 0xda6   : > { %v1544_v57 = vmul.f32 %v1797_v18, %v1536_v55 }
 0xda8   : > { %v1552_v58 = vadd.f32 %v1798_v56, %v1544_v57 }
 0xdaa   : > { %1553 = vst [vmem:[%s601_s16] sm:$0xff] %v1552_v58 }
 0xdab   : > { %2368 = shalt.err (!%p2365_p11)
}
 0xdac   : > { %s2369_s29 = scalar_lea.hbm %s3017_s8, 128  ;;  %s2373_s12 = scalar_lea.hbm %s3154_s17, 256 }
 0xdad   : > { %p2370_p5 = scmp.ne.s32.totalorder %s3017_s8, %s2369_s29  ;;  %p2374_p0 = scmp.lt.u32.totalorder %s3017_s8, %s3154_s17 }
 0xdae   : > { %p2375_p4 = scmp.lt.u32.totalorder %s2373_s12, %s2369_s29  ;;  %p2377_p13 = scmp.lt.u32.totalorder %s2369_s29, %s3017_s8 }
 0xdaf   : > { %p2371_p3 = pnand %p2370_p5, %p3155_p2 }
 0xdb0   : > { %p2376_p10 = por %p2375_p4, %p2374_p0 }
 0xdb1   : > { %p2372_p6 = pneg %p2371_p3 }
 0xdb2   : > { %p2378_p1 = por %p2377_p13, %p2376_p10 }
 0xdb4   : > { %p2379_p12 = pnand %p2378_p1, %p2372_p6 }
 0xdb6   : > { %2382 = shalt.err (!%p2379_p12)
}
 0xdb7   : > { %2005 = dma.vmem_to_hbm [thread:$0]  (%p3155_p2), %s3019_s23, 128, %s3017_s8, %s1555_s25  }
 0xdb8 PF: > { %s3156_s15 = sld [smem:[#allocation20_spill]]  ;;  %s3157_s22 = sld [smem:[#allocation27_spill]] }
 0xdb9   : > { %s3158_s24 = sld [smem:[#allocation23_spill]] }
 0xdbe   : > { %s1581_s30 = sand.u32 1, %s3156_s15   ;;  %p3159_p8 = scmp.ne.s32.totalorder %s3157_s22, 0 }
 0xdbf   : > { %p3160_p9 = scmp.ge.s32.totalorder %s3158_s24, 2  ;;  %s1582_s14 = scalar_lea.sflag [#allocation4], %s1581_s30 }
 0xdc1   : > { %p2031_p7 = pnand %p3160_p9, %p3159_p8 }
 0xdc3   : > { %2424 = dma.done.wait (!%p2031_p7), %s1582_s14, 128  }
 0xdc4   : > { %2426 = vsyncadd (!%p2031_p7), %s1582_s14, 4294967168  ;;  %s34_s30 = sadd.s32 1, %s3158_s24   ;;  %s3161_s1 = sld [smem:[#allocation26_spill]] }
 0xdc5   : > { %p31_p11 = scmp.ge.s32.totalorder %s34_s30, 4   ;;  %s3162_s28 = sld [smem:[#allocation22_spill]] }
 0xdc6   : > { %s3163_s29 = sld [smem:[#allocation24_spill]]  ;;  %s3164_s25 = smov %s2433_s26 }
 0xdc7   : > { %s3165_s26 = smov %s2437_s27  ;;  %33 = sbr.rel (!%p31_p11) target bundleno = 19 (0x13), region = 157 }
 0xdca   : > { %s3166_s27 = smov %s3161_s1 }
 0xdce   :  { %1587 = vsyncpa [#allocation3], 1 }
 0xdcf   :  { %1589 = vsyncpa [#allocation3 + $0x1], 1 }
 0xdd0   :  { %1590 = vsyncpa [#allocation6], 1 }
 0xdd1   :  { %1592 = vsyncpa [#allocation6 + $0x1], 1 }
 0xdd2   :  { %1593 = vsyncpa [#allocation9], 1 }
 0xdd3   :  { %1594 = vsyncpa [#allocation12], 1 }
 0xdd4   :  { %1595 = vsyncpa [#allocation4], 1 }
 0xdd5   :  { %1597 = vsyncpa [#allocation4 + $0x1], 1 }

</bundles_post_ra>
